<compile_context>
chip_gen: v7x
topology: tpu7x:2x2x1
jax: 0.10.0
libtpu: 0.0.40
codegen_flags: <defaults>
</compile_context>

<pallas_src>
import math
import functools

import jax
import jax.numpy as jnp
from jax.experimental import pallas as pl
from jax.experimental.pallas import tpu as pltpu


# ---------------------------------------------------------------------------
# Model hyper-parameters (small, consistent with the module's forward)
# ---------------------------------------------------------------------------
NUM_LAYERS = 2
D_MODEL = 32
NUM_HEADS = 4
D_FF = 64
D_HEAD = D_MODEL // NUM_HEADS
LN_EPS = 1e-5


# ---------------------------------------------------------------------------
# Pallas kernel: full encoder stack, whole (flattened) batch, single block
# ---------------------------------------------------------------------------
def _layernorm(x, gamma, beta):
    mu = jnp.mean(x, axis=-1, keepdims=True)
    xc = x - mu
    var = jnp.mean(xc * xc, axis=-1, keepdims=True)
    return xc * jax.lax.rsqrt(var + LN_EPS) * gamma + beta


def encoder_stack_kernel(
    x_ref,       # (B*S, D)       flattened activations
    mask_ref,    # (B*H, S, D)    0/1 head-lane mask, group g = h*B + b
    ln_ref,      # (L, 4, D)      rows: [gamma1, beta1, gamma2, beta2]
    wqkv_ref,    # (L, D, 3D)     fused [wq | wk | wv], stored [in, out]
    bqkv_ref,    # (L, 1, 3D)
    wo_ref,      # (L, D, D)
    bo_ref,      # (L, 1, D)
    w1_ref,      # (L, D, F)
    b1_ref,      # (L, 1, F)
    w2_ref,      # (L, F, D)
    b2_ref,      # (L, 1, D)
    o_ref,       # (B*S, D)
    *, batch, seq,
):
    x = x_ref[...]                                   # (BS, D) f32
    head_mask = mask_ref[...]                        # (B*H, S, D) 0/1
    scale = 1.0 / math.sqrt(D_HEAD)

    def to_groups(t2d):
        # (BS, D) -> (B, S, D): leading-dim split (S == sublane tile, no data
        # movement); replicate per head along the leading dim; mask the lanes
        # that do not belong to the group's head.
        t3 = t2d.reshape(batch, seq, D_MODEL)
        tg = jnp.concatenate([t3] * NUM_HEADS, axis=0)   # (B*H, S, D)
        return tg * head_mask

    for lyr in range(NUM_LAYERS):                    # static loop, all in VMEM
        ln = ln_ref[lyr]                             # (4, D)
        g1, be1, g2, be2 = ln[0:1], ln[1:2], ln[2:3], ln[3:4]

        # ---- sub-layer 1: pre-norm multi-head self-attention + residual ----
        xn = _layernorm(x, g1, be1)                  # (BS, D)
        qkv = (jnp.dot(xn, wqkv_ref[lyr], preferred_element_type=jnp.float32)
               + bqkv_ref[lyr])                      # (BS, 3D) one fused matmul
        q = qkv[:, 0:D_MODEL]
        k = qkv[:, D_MODEL:2 * D_MODEL]
        v = qkv[:, 2 * D_MODEL:3 * D_MODEL]

        qh, kh, vh = to_groups(q), to_groups(k), to_groups(v)   # (B*H, S, D)

        # Block-masked per-head scores: (q*m)·(k*m) == per-head contraction
        # (mask is 0/1).  One batched einsum with K = D_MODEL instead of
        # 8 tiny per-head 8x8x8 matmuls.
        s = jnp.einsum("gqd,gkd->gqk", qh, kh,
                       preferred_element_type=jnp.float32) * scale
        s = s - jnp.max(s, axis=-1, keepdims=True)
        e = jnp.exp(s)
        # EUP approximate reciprocal instead of a VPU divide.
        p = e * pl.reciprocal(jnp.sum(e, axis=-1, keepdims=True), approx=True)

        ctx = jnp.einsum("gqk,gkd->gqd", p, vh,
                         preferred_element_type=jnp.float32)    # (B*H, S, D)

        # Each group only populates its own head's lanes -> summing over the
        # head groups reassembles the full context (no concats, no slices
        # below lane-tile granularity).
        ctx_b = ctx[0:batch]
        for h in range(1, NUM_HEADS):
            ctx_b = ctx_b + ctx[h * batch:(h + 1) * batch]
        context = ctx_b.reshape(batch * seq, D_MODEL)            # (BS, D)

        attn_out = (jnp.dot(context, wo_ref[lyr],
                            preferred_element_type=jnp.float32) + bo_ref[lyr])
        x = x + attn_out                              # residual (dropout = id)

        # ---- sub-layer 2: pre-norm feed-forward + residual -----------------
        xn2 = _layernorm(x, g2, be2)
        h1 = (jnp.dot(xn2, w1_ref[lyr], preferred_element_type=jnp.float32)
              + b1_ref[lyr])
        h1 = jnp.maximum(h1, 0.0)                     # ReLU
        ff = (jnp.dot(h1, w2_ref[lyr], preferred_element_type=jnp.float32)
              + b2_ref[lyr])
        x = x + ff                                    # residual (dropout = id)

    o_ref[...] = x


# ---------------------------------------------------------------------------
# Wrapper: one pallas_call for the whole stack, single grid step
# ---------------------------------------------------------------------------
def _full_block(shape):
    nd = len(shape)
    return pl.BlockSpec(shape, lambda i, _nd=nd: (0,) * _nd)


def pack_params(layer_params):
    """Stack the per-layer tensors into 9 [L, ...] arrays (QKV fused)."""
    stack = lambda f: jnp.stack([f(p) for p in layer_params])
    ln_p = stack(lambda p: jnp.stack([p["g1"], p["b1"], p["g2"], p["b2"]]))      # (L,4,D)
    wqkv = stack(lambda p: jnp.concatenate([p["wq"], p["wk"], p["wv"]], axis=1))  # (L,D,3D)
    bqkv = stack(lambda p: jnp.concatenate([p["bq"], p["bk"], p["bv"]])
                 .reshape(1, 3 * D_MODEL))                                        # (L,1,3D)
    wo = stack(lambda p: p["wo"])                                                 # (L,D,D)
    bo = stack(lambda p: p["bo"].reshape(1, D_MODEL))                             # (L,1,D)
    w1 = stack(lambda p: p["w1"])                                                 # (L,D,F)
    b1 = stack(lambda p: p["fb1"].reshape(1, D_FF))                               # (L,1,F)
    w2 = stack(lambda p: p["w2"])                                                 # (L,F,D)
    b2 = stack(lambda p: p["fb2"].reshape(1, D_MODEL))                            # (L,1,D)
    return (ln_p, wqkv, bqkv, wo, bo, w1, b1, w2, b2)


def make_head_mask(batch, seq):
    """(B*H, S, D) 0/1 mask; group g = h*B + b keeps lanes of head h only."""
    lane_head = jnp.arange(D_MODEL) // D_HEAD                        # (D,)
    m_hd = (lane_head[None, :] == jnp.arange(NUM_HEADS)[:, None])    # (H, D)
    m = jnp.broadcast_to(m_hd[:, None, None, :].astype(jnp.float32),
                         (NUM_HEADS, batch, seq, D_MODEL))
    return m.reshape(NUM_HEADS * batch, seq, D_MODEL)


def transformer_encoder(x, layer_params):
    B, S, D = x.shape
    packed = pack_params(layer_params)
    x2 = x.reshape(B * S, D)                          # free wrapper reshape
    mask = make_head_mask(B, S)                       # built on host, tiny

    kernel = functools.partial(encoder_stack_kernel, batch=B, seq=S)
    inputs = (x2, mask) + packed
    in_specs = [_full_block(a.shape) for a in inputs]

    out = pl.pallas_call(
        kernel,
        out_shape=jax.ShapeDtypeStruct((B * S, D), x.dtype),
        grid_spec=pltpu.PrefetchScalarGridSpec(
            num_scalar_prefetch=0,
            grid=(1,),                                # one block: whole model
            in_specs=in_specs,
            out_specs=_full_block((B * S, D)),
        ),
        compiler_params=pltpu.CompilerParams(
            dimension_semantics=("arbitrary",)),
    )(*inputs)
    return out.reshape(B, S, D)


# ---------------------------------------------------------------------------
# Deterministic parameter init (PyTorch-like; weights stored [in, out])
# ---------------------------------------------------------------------------
def init_layer_params(key):
    ks = jax.random.split(key, 12)

    def linear(kw, kb, d_in, d_out):
        bound = 1.0 / math.sqrt(d_in)
        w = jax.random.uniform(kw, (d_in, d_out), jnp.float32, -bound, bound)
        b = jax.random.uniform(kb, (d_out,), jnp.float32, -bound, bound)
        return w, b

    wq, bq = linear(ks[0], ks[1], D_MODEL, D_MODEL)
    wk, bk = linear(ks[2], ks[3], D_MODEL, D_MODEL)
    wv, bv = linear(ks[4], ks[5], D_MODEL, D_MODEL)
    wo, bo = linear(ks[6], ks[7], D_MODEL, D_MODEL)
    w1, fb1 = linear(ks[8], ks[9], D_MODEL, D_FF)
    w2, fb2 = linear(ks[10], ks[11], D_FF, D_MODEL)

    return dict(
        g1=jnp.ones((D_MODEL,), jnp.float32), b1=jnp.zeros((D_MODEL,), jnp.float32),
        g2=jnp.ones((D_MODEL,), jnp.float32), b2=jnp.zeros((D_MODEL,), jnp.float32),
        wq=wq, bq=bq, wk=wk, bk=bk, wv=wv, bv=bv, wo=wo, bo=bo,
        w1=w1, fb1=fb1, w2=w2, fb2=fb2,
    )


# ---------------------------------------------------------------------------
# Pure-JAX reference (mirrors the PyTorch forward, eval mode)
# ---------------------------------------------------------------------------
def reference_layer(x, p):
    B, S, D = x.shape

    def ln(y, g, b):
        mu = jnp.mean(y, -1, keepdims=True)
        var = jnp.mean((y - mu) ** 2, -1, keepdims=True)
        return (y - mu) / jnp.sqrt(var + LN_EPS) * g + b

    xn = ln(x, p["g1"], p["b1"])
    q = xn @ p["wq"] + p["bq"]
    k = xn @ p["wk"] + p["bk"]
    v = xn @ p["wv"] + p["bv"]
    q = q.reshape(B, S, NUM_HEADS, D_HEAD).transpose(0, 2, 1, 3)
    k = k.reshape(B, S, NUM_HEADS, D_HEAD).transpose(0, 2, 1, 3)
    v = v.reshape(B, S, NUM_HEADS, D_HEAD).transpose(0, 2, 1, 3)
    scores = jnp.einsum("bhqd,bhkd->bhqk", q, k) / math.sqrt(D_HEAD)
    attn = jax.nn.softmax(scores, axis=-1)
    ctx = jnp.einsum("bhqk,bhkd->bhqd", attn, v)
    ctx = ctx.transpose(0, 2, 1, 3).reshape(B, S, D)
    x = x + (ctx @ p["wo"] + p["bo"])

    xn2 = ln(x, p["g2"], p["b2"])
    ff = jnp.maximum(xn2 @ p["w1"] + p["fb1"], 0.0) @ p["w2"] + p["fb2"]
    return x + ff


def reference_encoder(x, layer_params):
    out = x
    for p in layer_params:
        out = reference_layer(out, p)
    return out


# ---------------------------------------------------------------------------
if __name__ == "__main__":
    # NOTE: dropout / layer_drop are training-time stochastic ops; forward here
    # is eval-mode, so they are identity (matches module.eval()).
    B, S = 2, 8
    key = jax.random.PRNGKey(0)
    k_x, *k_layers = jax.random.split(key, 1 + NUM_LAYERS)

    x = jax.random.normal(k_x, (B, S, D_MODEL), dtype=jnp.float32)
    layer_params = [init_layer_params(k) for k in k_layers]

    out = transformer_encoder(x, layer_params)
    out = jax.block_until_ready(out)

    ref = reference_encoder(x, layer_params)
    assert out.shape == (B, S, D_MODEL)
    # Tolerance relaxed slightly vs. exact-divide version because the softmax
    # denominator uses the EUP approximate reciprocal (deliberate perf choice).
    err = jnp.max(jnp.abs(out - ref))
    assert jnp.allclose(out, ref, atol=2e-3, rtol=2e-3), f"max err {err}"

    print("KERNEL_OK")
</pallas_src>

<mosaic_0001>
module attributes {stable_mosaic.version = 11 : i64} {
  func.func @encoder_stack_kernel(%arg0: i32, %arg1: memref<16x32xf32, #tpu.memory_space<vmem>>, %arg2: memref<8x8x32xf32, #tpu.memory_space<vmem>>, %arg3: memref<2x4x32xf32, #tpu.memory_space<vmem>>, %arg4: memref<2x32x96xf32, #tpu.memory_space<vmem>>, %arg5: memref<2x1x96xf32, #tpu.memory_space<vmem>>, %arg6: memref<2x32x32xf32, #tpu.memory_space<vmem>>, %arg7: memref<2x1x32xf32, #tpu.memory_space<vmem>>, %arg8: memref<2x32x64xf32, #tpu.memory_space<vmem>>, %arg9: memref<2x1x64xf32, #tpu.memory_space<vmem>>, %arg10: memref<2x64x32xf32, #tpu.memory_space<vmem>>, %arg11: memref<2x1x32xf32, #tpu.memory_space<vmem>>, %arg12: memref<16x32xf32, #tpu.memory_space<vmem>>) attributes {dimension_semantics = [#tpu.dimension_semantics<arbitrary>], iteration_bounds = array<i64: 1>, scalar_prefetch = 0 : i64, scratch_operands = 0 : i64, tpu.core_type = #tpu.core_type<tc>, window_params = [{pipeline_mode = #tpu.pipeline_mode<synchronous>, transform_indices = @transform_0, window_bounds = array<i64: 16, 32>}, {pipeline_mode = #tpu.pipeline_mode<synchronous>, transform_indices = @transform_1, window_bounds = array<i64: 8, 8, 32>}, {pipeline_mode = #tpu.pipeline_mode<synchronous>, transform_indices = @transform_2, window_bounds = array<i64: 2, 4, 32>}, {pipeline_mode = #tpu.pipeline_mode<synchronous>, transform_indices = @transform_3, window_bounds = array<i64: 2, 32, 96>}, {pipeline_mode = #tpu.pipeline_mode<synchronous>, transform_indices = @transform_4, window_bounds = array<i64: 2, 1, 96>}, {pipeline_mode = #tpu.pipeline_mode<synchronous>, transform_indices = @transform_5, window_bounds = array<i64: 2, 32, 32>}, {pipeline_mode = #tpu.pipeline_mode<synchronous>, transform_indices = @transform_6, window_bounds = array<i64: 2, 1, 32>}, {pipeline_mode = #tpu.pipeline_mode<synchronous>, transform_indices = @transform_7, window_bounds = array<i64: 2, 32, 64>}, {pipeline_mode = #tpu.pipeline_mode<synchronous>, transform_indices = @transform_8, window_bounds = array<i64: 2, 1, 64>}, {pipeline_mode = #tpu.pipeline_mode<synchronous>, transform_indices = @transform_9, window_bounds = array<i64: 2, 64, 32>}, {pipeline_mode = #tpu.pipeline_mode<synchronous>, transform_indices = @transform_10, window_bounds = array<i64: 2, 1, 32>}, {pipeline_mode = #tpu.pipeline_mode<synchronous>, transform_indices = @transform_11, window_bounds = array<i64: 16, 32>}]} {
    %c0 = arith.constant 0 : index
    %c0_0 = arith.constant 0 : index
    %0 = vector.load %arg1[%c0, %c0_0] : memref<16x32xf32, #tpu.memory_space<vmem>>, vector<16x32xf32>
    %c0_1 = arith.constant 0 : index
    %c0_2 = arith.constant 0 : index
    %c0_3 = arith.constant 0 : index
    %1 = vector.load %arg2[%c0_1, %c0_2, %c0_3] : memref<8x8x32xf32, #tpu.memory_space<vmem>>, vector<8x8x32xf32>
    %c0_4 = arith.constant 0 : index
    %c0_5 = arith.constant 0 : index
    %c0_6 = arith.constant 0 : index
    %2 = vector.load %arg3[%c0_4, %c0_5, %c0_6] : memref<2x4x32xf32, #tpu.memory_space<vmem>>, vector<1x4x32xf32>
    %3 = vector.shape_cast %2 : vector<1x4x32xf32> to vector<4x32xf32>
    %4 = vector.extract_strided_slice %3 {offsets = [0, 0], sizes = [1, 32], strides = [1, 1]} : vector<4x32xf32> to vector<1x32xf32>
    %5 = vector.extract_strided_slice %3 {offsets = [1, 0], sizes = [1, 32], strides = [1, 1]} : vector<4x32xf32> to vector<1x32xf32>
    %6 = vector.extract_strided_slice %3 {offsets = [2, 0], sizes = [1, 32], strides = [1, 1]} : vector<4x32xf32> to vector<1x32xf32>
    %7 = vector.extract_strided_slice %3 {offsets = [3, 0], sizes = [1, 32], strides = [1, 1]} : vector<4x32xf32> to vector<1x32xf32>
    %cst = arith.constant dense<0.000000e+00> : vector<16xf32>
    %8 = vector.multi_reduction <add>, %0, %cst [1] : vector<16x32xf32> to vector<16xf32>
    %9 = vector.shape_cast %8 : vector<16xf32> to vector<16x1xf32>
    %cst_7 = arith.constant 3.200000e+01 : f32
    %10 = vector.broadcast %cst_7 : f32 to vector<16x1xf32>
    %11 = arith.divf %9, %10 : vector<16x1xf32>
    %12 = vector.broadcast %11 : vector<16x1xf32> to vector<16x32xf32>
    %13 = arith.subf %0, %12 : vector<16x32xf32>
    %14 = arith.mulf %13, %13 : vector<16x32xf32>
    %cst_8 = arith.constant dense<0.000000e+00> : vector<16xf32>
    %15 = vector.multi_reduction <add>, %14, %cst_8 [1] : vector<16x32xf32> to vector<16xf32>
    %16 = vector.shape_cast %15 : vector<16xf32> to vector<16x1xf32>
    %cst_9 = arith.constant 3.200000e+01 : f32
    %17 = vector.broadcast %cst_9 : f32 to vector<16x1xf32>
    %18 = arith.divf %16, %17 : vector<16x1xf32>
    %cst_10 = arith.constant 9.99999974E-6 : f32
    %19 = vector.broadcast %cst_10 : f32 to vector<16x1xf32>
    %20 = arith.addf %18, %19 : vector<16x1xf32>
    %21 = math.rsqrt %20 : vector<16x1xf32>
    %22 = vector.broadcast %21 : vector<16x1xf32> to vector<16x32xf32>
    %23 = arith.mulf %13, %22 : vector<16x32xf32>
    %24 = vector.broadcast %4 : vector<1x32xf32> to vector<16x32xf32>
    %25 = arith.mulf %23, %24 : vector<16x32xf32>
    %26 = vector.broadcast %5 : vector<1x32xf32> to vector<16x32xf32>
    %27 = arith.addf %25, %26 : vector<16x32xf32>
    %c0_11 = arith.constant 0 : index
    %c0_12 = arith.constant 0 : index
    %c0_13 = arith.constant 0 : index
    %28 = vector.load %arg4[%c0_11, %c0_12, %c0_13] : memref<2x32x96xf32, #tpu.memory_space<vmem>>, vector<1x32x96xf32>
    %29 = vector.shape_cast %28 : vector<1x32x96xf32> to vector<32x96xf32>
    %cst_14 = arith.constant dense<0.000000e+00> : vector<16x96xf32>
    %30 = tpu.matmul %27, %29, %cst_14 {dimension_numbers = #tpu.dot_dimension_numbers<[1], [0], [0], [1], [0, 0, 1, 1], [], []>} : vector<16x32xf32>, vector<32x96xf32>, vector<16x96xf32> -> vector<16x96xf32>
    %c0_15 = arith.constant 0 : index
    %c0_16 = arith.constant 0 : index
    %c0_17 = arith.constant 0 : index
    %31 = vector.load %arg5[%c0_15, %c0_16, %c0_17] : memref<2x1x96xf32, #tpu.memory_space<vmem>>, vector<1x1x96xf32>
    %32 = vector.shape_cast %31 : vector<1x1x96xf32> to vector<1x96xf32>
    %33 = vector.broadcast %32 : vector<1x96xf32> to vector<16x96xf32>
    %34 = arith.addf %30, %33 : vector<16x96xf32>
    %35 = vector.extract_strided_slice %34 {offsets = [0, 0], sizes = [16, 32], strides = [1, 1]} : vector<16x96xf32> to vector<16x32xf32>
    %36 = vector.extract_strided_slice %34 {offsets = [0, 32], sizes = [16, 32], strides = [1, 1]} : vector<16x96xf32> to vector<16x32xf32>
    %37 = vector.extract_strided_slice %34 {offsets = [0, 64], sizes = [16, 32], strides = [1, 1]} : vector<16x96xf32> to vector<16x32xf32>
    %38 = vector.shape_cast %35 : vector<16x32xf32> to vector<2x8x32xf32>
    %39 = tpu.concatenate %38, %38, %38, %38 in 0 : vector<2x8x32xf32>, vector<2x8x32xf32>, vector<2x8x32xf32>, vector<2x8x32xf32> -> vector<8x8x32xf32>
    %40 = arith.mulf %39, %1 : vector<8x8x32xf32>
    %41 = vector.shape_cast %36 : vector<16x32xf32> to vector<2x8x32xf32>
    %42 = tpu.concatenate %41, %41, %41, %41 in 0 : vector<2x8x32xf32>, vector<2x8x32xf32>, vector<2x8x32xf32>, vector<2x8x32xf32> -> vector<8x8x32xf32>
    %43 = arith.mulf %42, %1 : vector<8x8x32xf32>
    %44 = vector.shape_cast %37 : vector<16x32xf32> to vector<2x8x32xf32>
    %45 = tpu.concatenate %44, %44, %44, %44 in 0 : vector<2x8x32xf32>, vector<2x8x32xf32>, vector<2x8x32xf32>, vector<2x8x32xf32> -> vector<8x8x32xf32>
    %46 = arith.mulf %45, %1 : vector<8x8x32xf32>
    "tpu.trace_start"() <{level = 10 : i32, message = "gqd,gkd->gqk"}> : () -> ()
    %cst_18 = arith.constant dense<0.000000e+00> : vector<8x8x8xf32>
    %47 = tpu.matmul %40, %43, %cst_18 {dimension_numbers = #tpu.dot_dimension_numbers<[2], [2], [1], [1], [0, 0, 0, 1, 1, 1], [0], [0]>} : vector<8x8x32xf32>, vector<8x8x32xf32>, vector<8x8x8xf32> -> vector<8x8x8xf32>
    "tpu.trace_stop"() : () -> ()
    %cst_19 = arith.constant 0.353553385 : f32
    %48 = vector.broadcast %cst_19 : f32 to vector<8x8x8xf32>
    %49 = arith.mulf %47, %48 : vector<8x8x8xf32>
    %cst_20 = arith.constant dense<0xFF800000> : vector<8x8xf32>
    %50 = vector.multi_reduction <maximumf>, %49, %cst_20 [2] : vector<8x8x8xf32> to vector<8x8xf32>
    %51 = vector.shape_cast %50 : vector<8x8xf32> to vector<8x8x1xf32>
    %52 = vector.broadcast %51 : vector<8x8x1xf32> to vector<8x8x8xf32>
    %53 = arith.subf %49, %52 : vector<8x8x8xf32>
    %54 = math.exp %53 : vector<8x8x8xf32>
    %cst_21 = arith.constant dense<0.000000e+00> : vector<8x8xf32>
    %55 = vector.multi_reduction <add>, %54, %cst_21 [2] : vector<8x8x8xf32> to vector<8x8xf32>
    %56 = vector.shape_cast %55 : vector<8x8xf32> to vector<8x8x1xf32>
    %57 = tpu.reciprocal %56 {approx = true} : vector<8x8x1xf32> -> vector<8x8x1xf32>
    %58 = vector.broadcast %57 : vector<8x8x1xf32> to vector<8x8x8xf32>
    %59 = arith.mulf %54, %58 : vector<8x8x8xf32>
    "tpu.trace_start"() <{level = 10 : i32, message = "gqk,gkd->gqd"}> : () -> ()
    %cst_22 = arith.constant dense<0.000000e+00> : vector<8x8x32xf32>
    %60 = tpu.matmul %59, %46, %cst_22 {dimension_numbers = #tpu.dot_dimension_numbers<[2], [1], [1], [2], [0, 0, 0, 1, 1, 2], [0], [0]>} : vector<8x8x8xf32>, vector<8x8x32xf32>, vector<8x8x32xf32> -> vector<8x8x32xf32>
    "tpu.trace_stop"() : () -> ()
    %61 = vector.extract_strided_slice %60 {offsets = [0, 0, 0], sizes = [2, 8, 32], strides = [1, 1, 1]} : vector<8x8x32xf32> to vector<2x8x32xf32>
    %62 = vector.extract_strided_slice %60 {offsets = [2, 0, 0], sizes = [2, 8, 32], strides = [1, 1, 1]} : vector<8x8x32xf32> to vector<2x8x32xf32>
    %63 = arith.addf %61, %62 : vector<2x8x32xf32>
    %64 = vector.extract_strided_slice %60 {offsets = [4, 0, 0], sizes = [2, 8, 32], strides = [1, 1, 1]} : vector<8x8x32xf32> to vector<2x8x32xf32>
    %65 = arith.addf %63, %64 : vector<2x8x32xf32>
    %66 = vector.extract_strided_slice %60 {offsets = [6, 0, 0], sizes = [2, 8, 32], strides = [1, 1, 1]} : vector<8x8x32xf32> to vector<2x8x32xf32>
    %67 = arith.addf %65, %66 : vector<2x8x32xf32>
    %68 = vector.shape_cast %67 : vector<2x8x32xf32> to vector<16x32xf32>
    %c0_23 = arith.constant 0 : index
    %c0_24 = arith.constant 0 : index
    %c0_25 = arith.constant 0 : index
    %69 = vector.load %arg6[%c0_23, %c0_24, %c0_25] : memref<2x32x32xf32, #tpu.memory_space<vmem>>, vector<1x32x32xf32>
    %70 = vector.shape_cast %69 : vector<1x32x32xf32> to vector<32x32xf32>
    %cst_26 = arith.constant dense<0.000000e+00> : vector<16x32xf32>
    %71 = tpu.matmul %68, %70, %cst_26 {dimension_numbers = #tpu.dot_dimension_numbers<[1], [0], [0], [1], [0, 0, 1, 1], [], []>} : vector<16x32xf32>, vector<32x32xf32>, vector<16x32xf32> -> vector<16x32xf32>
    %c0_27 = arith.constant 0 : index
    %c0_28 = arith.constant 0 : index
    %c0_29 = arith.constant 0 : index
    %72 = vector.load %arg7[%c0_27, %c0_28, %c0_29] : memref<2x1x32xf32, #tpu.memory_space<vmem>>, vector<1x1x32xf32>
    %73 = vector.shape_cast %72 : vector<1x1x32xf32> to vector<1x32xf32>
    %74 = vector.broadcast %73 : vector<1x32xf32> to vector<16x32xf32>
    %75 = arith.addf %71, %74 : vector<16x32xf32>
    %76 = arith.addf %0, %75 : vector<16x32xf32>
    %cst_30 = arith.constant dense<0.000000e+00> : vector<16xf32>
    %77 = vector.multi_reduction <add>, %76, %cst_30 [1] : vector<16x32xf32> to vector<16xf32>
    %78 = vector.shape_cast %77 : vector<16xf32> to vector<16x1xf32>
    %cst_31 = arith.constant 3.200000e+01 : f32
    %79 = vector.broadcast %cst_31 : f32 to vector<16x1xf32>
    %80 = arith.divf %78, %79 : vector<16x1xf32>
    %81 = vector.broadcast %80 : vector<16x1xf32> to vector<16x32xf32>
    %82 = arith.subf %76, %81 : vector<16x32xf32>
    %83 = arith.mulf %82, %82 : vector<16x32xf32>
    %cst_32 = arith.constant dense<0.000000e+00> : vector<16xf32>
    %84 = vector.multi_reduction <add>, %83, %cst_32 [1] : vector<16x32xf32> to vector<16xf32>
    %85 = vector.shape_cast %84 : vector<16xf32> to vector<16x1xf32>
    %cst_33 = arith.constant 3.200000e+01 : f32
    %86 = vector.broadcast %cst_33 : f32 to vector<16x1xf32>
    %87 = arith.divf %85, %86 : vector<16x1xf32>
    %cst_34 = arith.constant 9.99999974E-6 : f32
    %88 = vector.broadcast %cst_34 : f32 to vector<16x1xf32>
    %89 = arith.addf %87, %88 : vector<16x1xf32>
    %90 = math.rsqrt %89 : vector<16x1xf32>
    %91 = vector.broadcast %90 : vector<16x1xf32> to vector<16x32xf32>
    %92 = arith.mulf %82, %91 : vector<16x32xf32>
    %93 = vector.broadcast %6 : vector<1x32xf32> to vector<16x32xf32>
    %94 = arith.mulf %92, %93 : vector<16x32xf32>
    %95 = vector.broadcast %7 : vector<1x32xf32> to vector<16x32xf32>
    %96 = arith.addf %94, %95 : vector<16x32xf32>
    %c0_35 = arith.constant 0 : index
    %c0_36 = arith.constant 0 : index
    %c0_37 = arith.constant 0 : index
    %97 = vector.load %arg8[%c0_35, %c0_36, %c0_37] : memref<2x32x64xf32, #tpu.memory_space<vmem>>, vector<1x32x64xf32>
    %98 = vector.shape_cast %97 : vector<1x32x64xf32> to vector<32x64xf32>
    %cst_38 = arith.constant dense<0.000000e+00> : vector<16x64xf32>
    %99 = tpu.matmul %96, %98, %cst_38 {dimension_numbers = #tpu.dot_dimension_numbers<[1], [0], [0], [1], [0, 0, 1, 1], [], []>} : vector<16x32xf32>, vector<32x64xf32>, vector<16x64xf32> -> vector<16x64xf32>
    %c0_39 = arith.constant 0 : index
    %c0_40 = arith.constant 0 : index
    %c0_41 = arith.constant 0 : index
    %100 = vector.load %arg9[%c0_39, %c0_40, %c0_41] : memref<2x1x64xf32, #tpu.memory_space<vmem>>, vector<1x1x64xf32>
    %101 = vector.shape_cast %100 : vector<1x1x64xf32> to vector<1x64xf32>
    %102 = vector.broadcast %101 : vector<1x64xf32> to vector<16x64xf32>
    %103 = arith.addf %99, %102 : vector<16x64xf32>
    %cst_42 = arith.constant 0.000000e+00 : f32
    %104 = vector.broadcast %cst_42 : f32 to vector<16x64xf32>
    %105 = arith.maximumf %103, %104 : vector<16x64xf32>
    %c0_43 = arith.constant 0 : index
    %c0_44 = arith.constant 0 : index
    %c0_45 = arith.constant 0 : index
    %106 = vector.load %arg10[%c0_43, %c0_44, %c0_45] : memref<2x64x32xf32, #tpu.memory_space<vmem>>, vector<1x64x32xf32>
    %107 = vector.shape_cast %106 : vector<1x64x32xf32> to vector<64x32xf32>
    %cst_46 = arith.constant dense<0.000000e+00> : vector<16x32xf32>
    %108 = tpu.matmul %105, %107, %cst_46 {dimension_numbers = #tpu.dot_dimension_numbers<[1], [0], [0], [1], [0, 0, 1, 1], [], []>} : vector<16x64xf32>, vector<64x32xf32>, vector<16x32xf32> -> vector<16x32xf32>
    %c0_47 = arith.constant 0 : index
    %c0_48 = arith.constant 0 : index
    %c0_49 = arith.constant 0 : index
    %109 = vector.load %arg11[%c0_47, %c0_48, %c0_49] : memref<2x1x32xf32, #tpu.memory_space<vmem>>, vector<1x1x32xf32>
    %110 = vector.shape_cast %109 : vector<1x1x32xf32> to vector<1x32xf32>
    %111 = vector.broadcast %110 : vector<1x32xf32> to vector<16x32xf32>
    %112 = arith.addf %108, %111 : vector<16x32xf32>
    %113 = arith.addf %76, %112 : vector<16x32xf32>
    %c1 = arith.constant 1 : index
    %c0_50 = arith.constant 0 : index
    %c0_51 = arith.constant 0 : index
    %114 = vector.load %arg3[%c1, %c0_50, %c0_51] : memref<2x4x32xf32, #tpu.memory_space<vmem>>, vector<1x4x32xf32>
    %115 = vector.shape_cast %114 : vector<1x4x32xf32> to vector<4x32xf32>
    %116 = vector.extract_strided_slice %115 {offsets = [0, 0], sizes = [1, 32], strides = [1, 1]} : vector<4x32xf32> to vector<1x32xf32>
    %117 = vector.extract_strided_slice %115 {offsets = [1, 0], sizes = [1, 32], strides = [1, 1]} : vector<4x32xf32> to vector<1x32xf32>
    %118 = vector.extract_strided_slice %115 {offsets = [2, 0], sizes = [1, 32], strides = [1, 1]} : vector<4x32xf32> to vector<1x32xf32>
    %119 = vector.extract_strided_slice %115 {offsets = [3, 0], sizes = [1, 32], strides = [1, 1]} : vector<4x32xf32> to vector<1x32xf32>
    %cst_52 = arith.constant dense<0.000000e+00> : vector<16xf32>
    %120 = vector.multi_reduction <add>, %113, %cst_52 [1] : vector<16x32xf32> to vector<16xf32>
    %121 = vector.shape_cast %120 : vector<16xf32> to vector<16x1xf32>
    %cst_53 = arith.constant 3.200000e+01 : f32
    %122 = vector.broadcast %cst_53 : f32 to vector<16x1xf32>
    %123 = arith.divf %121, %122 : vector<16x1xf32>
    %124 = vector.broadcast %123 : vector<16x1xf32> to vector<16x32xf32>
    %125 = arith.subf %113, %124 : vector<16x32xf32>
    %126 = arith.mulf %125, %125 : vector<16x32xf32>
    %cst_54 = arith.constant dense<0.000000e+00> : vector<16xf32>
    %127 = vector.multi_reduction <add>, %126, %cst_54 [1] : vector<16x32xf32> to vector<16xf32>
    %128 = vector.shape_cast %127 : vector<16xf32> to vector<16x1xf32>
    %cst_55 = arith.constant 3.200000e+01 : f32
    %129 = vector.broadcast %cst_55 : f32 to vector<16x1xf32>
    %130 = arith.divf %128, %129 : vector<16x1xf32>
    %cst_56 = arith.constant 9.99999974E-6 : f32
    %131 = vector.broadcast %cst_56 : f32 to vector<16x1xf32>
    %132 = arith.addf %130, %131 : vector<16x1xf32>
    %133 = math.rsqrt %132 : vector<16x1xf32>
    %134 = vector.broadcast %133 : vector<16x1xf32> to vector<16x32xf32>
    %135 = arith.mulf %125, %134 : vector<16x32xf32>
    %136 = vector.broadcast %116 : vector<1x32xf32> to vector<16x32xf32>
    %137 = arith.mulf %135, %136 : vector<16x32xf32>
    %138 = vector.broadcast %117 : vector<1x32xf32> to vector<16x32xf32>
    %139 = arith.addf %137, %138 : vector<16x32xf32>
    %c1_57 = arith.constant 1 : index
    %c0_58 = arith.constant 0 : index
    %c0_59 = arith.constant 0 : index
    %140 = vector.load %arg4[%c1_57, %c0_58, %c0_59] : memref<2x32x96xf32, #tpu.memory_space<vmem>>, vector<1x32x96xf32>
    %141 = vector.shape_cast %140 : vector<1x32x96xf32> to vector<32x96xf32>
    %cst_60 = arith.constant dense<0.000000e+00> : vector<16x96xf32>
    %142 = tpu.matmul %139, %141, %cst_60 {dimension_numbers = #tpu.dot_dimension_numbers<[1], [0], [0], [1], [0, 0, 1, 1], [], []>} : vector<16x32xf32>, vector<32x96xf32>, vector<16x96xf32> -> vector<16x96xf32>
    %c1_61 = arith.constant 1 : index
    %c0_62 = arith.constant 0 : index
    %c0_63 = arith.constant 0 : index
    %143 = vector.load %arg5[%c1_61, %c0_62, %c0_63] : memref<2x1x96xf32, #tpu.memory_space<vmem>>, vector<1x1x96xf32>
    %144 = vector.shape_cast %143 : vector<1x1x96xf32> to vector<1x96xf32>
    %145 = vector.broadcast %144 : vector<1x96xf32> to vector<16x96xf32>
    %146 = arith.addf %142, %145 : vector<16x96xf32>
    %147 = vector.extract_strided_slice %146 {offsets = [0, 0], sizes = [16, 32], strides = [1, 1]} : vector<16x96xf32> to vector<16x32xf32>
    %148 = vector.extract_strided_slice %146 {offsets = [0, 32], sizes = [16, 32], strides = [1, 1]} : vector<16x96xf32> to vector<16x32xf32>
    %149 = vector.extract_strided_slice %146 {offsets = [0, 64], sizes = [16, 32], strides = [1, 1]} : vector<16x96xf32> to vector<16x32xf32>
    %150 = vector.shape_cast %147 : vector<16x32xf32> to vector<2x8x32xf32>
    %151 = tpu.concatenate %150, %150, %150, %150 in 0 : vector<2x8x32xf32>, vector<2x8x32xf32>, vector<2x8x32xf32>, vector<2x8x32xf32> -> vector<8x8x32xf32>
    %152 = arith.mulf %151, %1 : vector<8x8x32xf32>
    %153 = vector.shape_cast %148 : vector<16x32xf32> to vector<2x8x32xf32>
    %154 = tpu.concatenate %153, %153, %153, %153 in 0 : vector<2x8x32xf32>, vector<2x8x32xf32>, vector<2x8x32xf32>, vector<2x8x32xf32> -> vector<8x8x32xf32>
    %155 = arith.mulf %154, %1 : vector<8x8x32xf32>
    %156 = vector.shape_cast %149 : vector<16x32xf32> to vector<2x8x32xf32>
    %157 = tpu.concatenate %156, %156, %156, %156 in 0 : vector<2x8x32xf32>, vector<2x8x32xf32>, vector<2x8x32xf32>, vector<2x8x32xf32> -> vector<8x8x32xf32>
    %158 = arith.mulf %157, %1 : vector<8x8x32xf32>
    "tpu.trace_start"() <{level = 10 : i32, message = "gqd,gkd->gqk"}> : () -> ()
    %cst_64 = arith.constant dense<0.000000e+00> : vector<8x8x8xf32>
    %159 = tpu.matmul %152, %155, %cst_64 {dimension_numbers = #tpu.dot_dimension_numbers<[2], [2], [1], [1], [0, 0, 0, 1, 1, 1], [0], [0]>} : vector<8x8x32xf32>, vector<8x8x32xf32>, vector<8x8x8xf32> -> vector<8x8x8xf32>
    "tpu.trace_stop"() : () -> ()
    %cst_65 = arith.constant 0.353553385 : f32
    %160 = vector.broadcast %cst_65 : f32 to vector<8x8x8xf32>
    %161 = arith.mulf %159, %160 : vector<8x8x8xf32>
    %cst_66 = arith.constant dense<0xFF800000> : vector<8x8xf32>
    %162 = vector.multi_reduction <maximumf>, %161, %cst_66 [2] : vector<8x8x8xf32> to vector<8x8xf32>
    %163 = vector.shape_cast %162 : vector<8x8xf32> to vector<8x8x1xf32>
    %164 = vector.broadcast %163 : vector<8x8x1xf32> to vector<8x8x8xf32>
    %165 = arith.subf %161, %164 : vector<8x8x8xf32>
    %166 = math.exp %165 : vector<8x8x8xf32>
    %cst_67 = arith.constant dense<0.000000e+00> : vector<8x8xf32>
    %167 = vector.multi_reduction <add>, %166, %cst_67 [2] : vector<8x8x8xf32> to vector<8x8xf32>
    %168 = vector.shape_cast %167 : vector<8x8xf32> to vector<8x8x1xf32>
    %169 = tpu.reciprocal %168 {approx = true} : vector<8x8x1xf32> -> vector<8x8x1xf32>
    %170 = vector.broadcast %169 : vector<8x8x1xf32> to vector<8x8x8xf32>
    %171 = arith.mulf %166, %170 : vector<8x8x8xf32>
    "tpu.trace_start"() <{level = 10 : i32, message = "gqk,gkd->gqd"}> : () -> ()
    %cst_68 = arith.constant dense<0.000000e+00> : vector<8x8x32xf32>
    %172 = tpu.matmul %171, %158, %cst_68 {dimension_numbers = #tpu.dot_dimension_numbers<[2], [1], [1], [2], [0, 0, 0, 1, 1, 2], [0], [0]>} : vector<8x8x8xf32>, vector<8x8x32xf32>, vector<8x8x32xf32> -> vector<8x8x32xf32>
    "tpu.trace_stop"() : () -> ()
    %173 = vector.extract_strided_slice %172 {offsets = [0, 0, 0], sizes = [2, 8, 32], strides = [1, 1, 1]} : vector<8x8x32xf32> to vector<2x8x32xf32>
    %174 = vector.extract_strided_slice %172 {offsets = [2, 0, 0], sizes = [2, 8, 32], strides = [1, 1, 1]} : vector<8x8x32xf32> to vector<2x8x32xf32>
    %175 = arith.addf %173, %174 : vector<2x8x32xf32>
    %176 = vector.extract_strided_slice %172 {offsets = [4, 0, 0], sizes = [2, 8, 32], strides = [1, 1, 1]} : vector<8x8x32xf32> to vector<2x8x32xf32>
    %177 = arith.addf %175, %176 : vector<2x8x32xf32>
    %178 = vector.extract_strided_slice %172 {offsets = [6, 0, 0], sizes = [2, 8, 32], strides = [1, 1, 1]} : vector<8x8x32xf32> to vector<2x8x32xf32>
    %179 = arith.addf %177, %178 : vector<2x8x32xf32>
    %180 = vector.shape_cast %179 : vector<2x8x32xf32> to vector<16x32xf32>
    %c1_69 = arith.constant 1 : index
    %c0_70 = arith.constant 0 : index
    %c0_71 = arith.constant 0 : index
    %181 = vector.load %arg6[%c1_69, %c0_70, %c0_71] : memref<2x32x32xf32, #tpu.memory_space<vmem>>, vector<1x32x32xf32>
    %182 = vector.shape_cast %181 : vector<1x32x32xf32> to vector<32x32xf32>
    %cst_72 = arith.constant dense<0.000000e+00> : vector<16x32xf32>
    %183 = tpu.matmul %180, %182, %cst_72 {dimension_numbers = #tpu.dot_dimension_numbers<[1], [0], [0], [1], [0, 0, 1, 1], [], []>} : vector<16x32xf32>, vector<32x32xf32>, vector<16x32xf32> -> vector<16x32xf32>
    %c1_73 = arith.constant 1 : index
    %c0_74 = arith.constant 0 : index
    %c0_75 = arith.constant 0 : index
    %184 = vector.load %arg7[%c1_73, %c0_74, %c0_75] : memref<2x1x32xf32, #tpu.memory_space<vmem>>, vector<1x1x32xf32>
    %185 = vector.shape_cast %184 : vector<1x1x32xf32> to vector<1x32xf32>
    %186 = vector.broadcast %185 : vector<1x32xf32> to vector<16x32xf32>
    %187 = arith.addf %183, %186 : vector<16x32xf32>
    %188 = arith.addf %113, %187 : vector<16x32xf32>
    %cst_76 = arith.constant dense<0.000000e+00> : vector<16xf32>
    %189 = vector.multi_reduction <add>, %188, %cst_76 [1] : vector<16x32xf32> to vector<16xf32>
    %190 = vector.shape_cast %189 : vector<16xf32> to vector<16x1xf32>
    %cst_77 = arith.constant 3.200000e+01 : f32
    %191 = vector.broadcast %cst_77 : f32 to vector<16x1xf32>
    %192 = arith.divf %190, %191 : vector<16x1xf32>
    %193 = vector.broadcast %192 : vector<16x1xf32> to vector<16x32xf32>
    %194 = arith.subf %188, %193 : vector<16x32xf32>
    %195 = arith.mulf %194, %194 : vector<16x32xf32>
    %cst_78 = arith.constant dense<0.000000e+00> : vector<16xf32>
    %196 = vector.multi_reduction <add>, %195, %cst_78 [1] : vector<16x32xf32> to vector<16xf32>
    %197 = vector.shape_cast %196 : vector<16xf32> to vector<16x1xf32>
    %cst_79 = arith.constant 3.200000e+01 : f32
    %198 = vector.broadcast %cst_79 : f32 to vector<16x1xf32>
    %199 = arith.divf %197, %198 : vector<16x1xf32>
    %cst_80 = arith.constant 9.99999974E-6 : f32
    %200 = vector.broadcast %cst_80 : f32 to vector<16x1xf32>
    %201 = arith.addf %199, %200 : vector<16x1xf32>
    %202 = math.rsqrt %201 : vector<16x1xf32>
    %203 = vector.broadcast %202 : vector<16x1xf32> to vector<16x32xf32>
    %204 = arith.mulf %194, %203 : vector<16x32xf32>
    %205 = vector.broadcast %118 : vector<1x32xf32> to vector<16x32xf32>
    %206 = arith.mulf %204, %205 : vector<16x32xf32>
    %207 = vector.broadcast %119 : vector<1x32xf32> to vector<16x32xf32>
    %208 = arith.addf %206, %207 : vector<16x32xf32>
    %c1_81 = arith.constant 1 : index
    %c0_82 = arith.constant 0 : index
    %c0_83 = arith.constant 0 : index
    %209 = vector.load %arg8[%c1_81, %c0_82, %c0_83] : memref<2x32x64xf32, #tpu.memory_space<vmem>>, vector<1x32x64xf32>
    %210 = vector.shape_cast %209 : vector<1x32x64xf32> to vector<32x64xf32>
    %cst_84 = arith.constant dense<0.000000e+00> : vector<16x64xf32>
    %211 = tpu.matmul %208, %210, %cst_84 {dimension_numbers = #tpu.dot_dimension_numbers<[1], [0], [0], [1], [0, 0, 1, 1], [], []>} : vector<16x32xf32>, vector<32x64xf32>, vector<16x64xf32> -> vector<16x64xf32>
    %c1_85 = arith.constant 1 : index
    %c0_86 = arith.constant 0 : index
    %c0_87 = arith.constant 0 : index
    %212 = vector.load %arg9[%c1_85, %c0_86, %c0_87] : memref<2x1x64xf32, #tpu.memory_space<vmem>>, vector<1x1x64xf32>
    %213 = vector.shape_cast %212 : vector<1x1x64xf32> to vector<1x64xf32>
    %214 = vector.broadcast %213 : vector<1x64xf32> to vector<16x64xf32>
    %215 = arith.addf %211, %214 : vector<16x64xf32>
    %cst_88 = arith.constant 0.000000e+00 : f32
    %216 = vector.broadcast %cst_88 : f32 to vector<16x64xf32>
    %217 = arith.maximumf %215, %216 : vector<16x64xf32>
    %c1_89 = arith.constant 1 : index
    %c0_90 = arith.constant 0 : index
    %c0_91 = arith.constant 0 : index
    %218 = vector.load %arg10[%c1_89, %c0_90, %c0_91] : memref<2x64x32xf32, #tpu.memory_space<vmem>>, vector<1x64x32xf32>
    %219 = vector.shape_cast %218 : vector<1x64x32xf32> to vector<64x32xf32>
    %cst_92 = arith.constant dense<0.000000e+00> : vector<16x32xf32>
    %220 = tpu.matmul %217, %219, %cst_92 {dimension_numbers = #tpu.dot_dimension_numbers<[1], [0], [0], [1], [0, 0, 1, 1], [], []>} : vector<16x64xf32>, vector<64x32xf32>, vector<16x32xf32> -> vector<16x32xf32>
    %c1_93 = arith.constant 1 : index
    %c0_94 = arith.constant 0 : index
    %c0_95 = arith.constant 0 : index
    %221 = vector.load %arg11[%c1_93, %c0_94, %c0_95] : memref<2x1x32xf32, #tpu.memory_space<vmem>>, vector<1x1x32xf32>
    %222 = vector.shape_cast %221 : vector<1x1x32xf32> to vector<1x32xf32>
    %223 = vector.broadcast %222 : vector<1x32xf32> to vector<16x32xf32>
    %224 = arith.addf %220, %223 : vector<16x32xf32>
    %225 = arith.addf %188, %224 : vector<16x32xf32>
    %c0_96 = arith.constant 0 : index
    %c0_97 = arith.constant 0 : index
    %226 = vector.load %arg12[%c0_96, %c0_97] : memref<16x32xf32, #tpu.memory_space<vmem>>, vector<16x32xf32>
    tpu.vector_store %arg12[%c0_96, %c0_97], %225 {strides = array<i32>} : memref<16x32xf32, #tpu.memory_space<vmem>>, vector<16x32xf32>,
    return
  }
  func.func @transform_0(%arg0: i32) -> (i32, i32) {
    %c0_i32 = arith.constant 0 : i32
    %c0_i32_0 = arith.constant 0 : i32
    %c0_i32_1 = arith.constant 0 : i32
    return %c0_i32, %c0_i32_0 : i32, i32
  }
  func.func @transform_1(%arg0: i32) -> (i32, i32, i32) {
    %c0_i32 = arith.constant 0 : i32
    %c0_i32_0 = arith.constant 0 : i32
    %c0_i32_1 = arith.constant 0 : i32
    %c0_i32_2 = arith.constant 0 : i32
    return %c0_i32, %c0_i32_0, %c0_i32_1 : i32, i32, i32
  }
  func.func @transform_2(%arg0: i32) -> (i32, i32, i32) {
    %c0_i32 = arith.constant 0 : i32
    %c0_i32_0 = arith.constant 0 : i32
    %c0_i32_1 = arith.constant 0 : i32
    %c0_i32_2 = arith.constant 0 : i32
    return %c0_i32, %c0_i32_0, %c0_i32_1 : i32, i32, i32
  }
  func.func @transform_3(%arg0: i32) -> (i32, i32, i32) {
    %c0_i32 = arith.constant 0 : i32
    %c0_i32_0 = arith.constant 0 : i32
    %c0_i32_1 = arith.constant 0 : i32
    %c0_i32_2 = arith.constant 0 : i32
    return %c0_i32, %c0_i32_0, %c0_i32_1 : i32, i32, i32
  }
  func.func @transform_4(%arg0: i32) -> (i32, i32, i32) {
    %c0_i32 = arith.constant 0 : i32
    %c0_i32_0 = arith.constant 0 : i32
    %c0_i32_1 = arith.constant 0 : i32
    %c0_i32_2 = arith.constant 0 : i32
    return %c0_i32, %c0_i32_0, %c0_i32_1 : i32, i32, i32
  }
  func.func @transform_5(%arg0: i32) -> (i32, i32, i32) {
    %c0_i32 = arith.constant 0 : i32
    %c0_i32_0 = arith.constant 0 : i32
    %c0_i32_1 = arith.constant 0 : i32
    %c0_i32_2 = arith.constant 0 : i32
    return %c0_i32, %c0_i32_0, %c0_i32_1 : i32, i32, i32
  }
  func.func @transform_6(%arg0: i32) -> (i32, i32, i32) {
    %c0_i32 = arith.constant 0 : i32
    %c0_i32_0 = arith.constant 0 : i32
    %c0_i32_1 = arith.constant 0 : i32
    %c0_i32_2 = arith.constant 0 : i32
    return %c0_i32, %c0_i32_0, %c0_i32_1 : i32, i32, i32
  }
  func.func @transform_7(%arg0: i32) -> (i32, i32, i32) {
    %c0_i32 = arith.constant 0 : i32
    %c0_i32_0 = arith.constant 0 : i32
    %c0_i32_1 = arith.constant 0 : i32
    %c0_i32_2 = arith.constant 0 : i32
    return %c0_i32, %c0_i32_0, %c0_i32_1 : i32, i32, i32
  }
  func.func @transform_8(%arg0: i32) -> (i32, i32, i32) {
    %c0_i32 = arith.constant 0 : i32
    %c0_i32_0 = arith.constant 0 : i32
    %c0_i32_1 = arith.constant 0 : i32
    %c0_i32_2 = arith.constant 0 : i32
    return %c0_i32, %c0_i32_0, %c0_i32_1 : i32, i32, i32
  }
  func.func @transform_9(%arg0: i32) -> (i32, i32, i32) {
    %c0_i32 = arith.constant 0 : i32
    %c0_i32_0 = arith.constant 0 : i32
    %c0_i32_1 = arith.constant 0 : i32
    %c0_i32_2 = arith.constant 0 : i32
    return %c0_i32, %c0_i32_0, %c0_i32_1 : i32, i32, i32
  }
  func.func @transform_10(%arg0: i32) -> (i32, i32, i32) {
    %c0_i32 = arith.constant 0 : i32
    %c0_i32_0 = arith.constant 0 : i32
    %c0_i32_1 = arith.constant 0 : i32
    %c0_i32_2 = arith.constant 0 : i32
    return %c0_i32, %c0_i32_0, %c0_i32_1 : i32, i32, i32
  }
  func.func @transform_11(%arg0: i32) -> (i32, i32) {
    %c0_i32 = arith.constant 0 : i32
    %c0_i32_0 = arith.constant 0 : i32
    %c0_i32_1 = arith.constant 0 : i32
    return %c0_i32, %c0_i32_0 : i32, i32
  }
}

</mosaic_0001>

<bundles_post_ra>
// kernel: tpu_custom_call.1
= control target key start
LH: loop header
LB: loop body
LE: loop exit
PB: predicated region body
PF: predicated region fallthrough
CT: control target
= control target key end

     0   :  { %16 = vsyncpa [#allocation3], 0  ;;  %s5436_s0 = inlined_call_operand.hbm [shape: f32[16,32], index: 0, kind: input, shape index: {}]   ;;  %s5437_s1 = inlined_call_operand.vmem [shape: f32[8,8,32], index: 1, kind: input, shape index: {}]   ;;  %s5438_s2 = inlined_call_operand.hbm [shape: f32[2,4,32], index: 2, kind: input, shape index: {}]   ;;  %s5439_s3 = inlined_call_operand.vmem [shape: f32[2,32,96], index: 3, kind: input, shape index: {}]   ;;  %s5440_s4 = inlined_call_operand.vmem [shape: f32[2,1,96], index: 4, kind: input, shape index: {}]   ;;  %s5441_s5 = inlined_call_operand.vmem [shape: f32[2,32,32], index: 5, kind: input, shape index: {}]   ;;  %s5442_s6 = inlined_call_operand.vmem [shape: f32[2,1,32], index: 6, kind: input, shape index: {}]   ;;  %s5443_s7 = inlined_call_operand.hbm [shape: f32[2,32,64], index: 7, kind: input, shape index: {}]   ;;  %s5444_s8 = inlined_call_operand.vmem [shape: f32[2,1,64], index: 8, kind: input, shape index: {}]   ;;  %s5445_s9 = inlined_call_operand.vmem [shape: f32[2,64,32], index: 9, kind: input, shape index: {}]   ;;  %s5446_s10 = inlined_call_operand.vmem [shape: f32[2,1,32], index: 10, kind: input, shape index: {}]   ;;  %s5447_s11 = inlined_call_operand.hbm [shape: f32[16,32], index: 11, kind: output, shape index: {}]  }
   0x1   :  { %17 = vsyncpa [#allocation6], 0 }
   0x2   :  { %18 = vsyncpa [#allocation4], 0  ;;  %s4593_s17 = smov [#allocation5]   ;;  %s4499_s21 = scalar_lea.hbm %s5438_s2, 128 }
   0x3   :  { %s38_s18 = sshll.u32 %s4593_s17, 4  ;;  %p4500_p0 = scmp.ne.s32.totalorder %s5438_s2, %s4499_s21  ;;  %s39_s18 = int_to_ptr.vmem [resolvable:$true] %s38_s18 }
   0x4   :  { %p4503_p1 = scmp.lt.u32.totalorder %s4499_s21, %s5438_s2 }
   0x6   :  { %p4505_p2 = pnand %p4503_p1, %p4500_p0 }
   0x8   :  { %4508 = shalt.err (!%p4505_p2)
}
   0x9   :  { %s4509_s26 = scalar_lea.vmem %s39_s18, 128  ;;  %p4514_p4 = scmp.lt.s32.totalorder %s39_s18, %s39_s18 }
   0xa   :  { %p4510_p3 = scmp.ne.s32.totalorder %s39_s18, %s4509_s26  ;;  %p4515_p5 = scmp.lt.s32.totalorder %s4509_s26, %s4509_s26 }
   0xc   :  { %p4516_p6 = por %p4515_p5, %p4514_p4 }
   0xe   :  { %p4517_p7 = pnand %p4516_p6, %p4510_p3 }
  0x10   :  { %4520 = shalt.err (!%p4517_p7)
}
  0x11   :  { %s4594_s27 = smov 64   ;;  %s4595_s28 = smov 4  }
  0x12   :  { %44 = dma.hbm_to_vmem [thread:$0]  %s5438_s2, 128, %s39_s18, [#allocation6], %s4594_s27, %s4594_s27, %s4595_s28  }
  0x13   :  { %s4596_s12 = smov [#allocation2]   ;;  %s4521_s16 = scalar_lea.hbm %s5436_s0, 256 }
  0x14   :  { %s24_s13 = sshll.u32 %s4596_s12, 4  ;;  %p4522_p8 = scmp.ne.s32.totalorder %s5436_s0, %s4521_s16  ;;  %s25_s13 = int_to_ptr.vmem [resolvable:$true] %s24_s13 }
  0x15   :  { %p4525_p9 = scmp.lt.u32.totalorder %s4521_s16, %s5436_s0 }
  0x17   :  { %p4527_p10 = pnand %p4525_p9, %p4522_p8 }
  0x19   :  { %4530 = shalt.err (!%p4527_p10)
}
  0x1a   :  { %s4531_s22 = scalar_lea.vmem %s25_s13, 256  ;;  %p4536_p12 = scmp.lt.s32.totalorder %s25_s13, %s25_s13 }
  0x1b   :  { %p4532_p11 = scmp.ne.s32.totalorder %s25_s13, %s4531_s22  ;;  %p4537_p13 = scmp.lt.s32.totalorder %s4531_s22, %s4531_s22 }
  0x1d   :  { %p4538_p0 = por %p4537_p13, %p4536_p12 }
  0x1f   :  { %p4539_p1 = pnand %p4538_p0, %p4532_p11 }
  0x21   :  { %4542 = shalt.err (!%p4539_p1)
}
  0x22   :  { %s4597_s2 = smov 128   ;;  %s4598_s18 = smov 8  }
  0x23   :  { %30 = dma.hbm_to_vmem [thread:$0]  %s5436_s0, 256, %s25_s13, [#allocation3], %s4597_s2, %s4597_s2, %s4598_s18  }
  0x24   :  { %s4599_s25 = smov [#allocation7]   ;;  %s4543_s30 = scalar_lea.hbm %s5443_s7, 1024 }
  0x25   :  { %s58_s26 = sshll.u32 %s4599_s25, 4  ;;  %p4544_p2 = scmp.ne.s32.totalorder %s5443_s7, %s4543_s30  ;;  %s59_s26 = int_to_ptr.vmem [resolvable:$true] %s58_s26 }
  0x26   :  { %p4547_p3 = scmp.lt.u32.totalorder %s4543_s30, %s5443_s7 }
  0x28   :  { %p4549_p4 = pnand %p4547_p3, %p4544_p2 }
  0x2a   :  { %4552 = shalt.err (!%p4549_p4)
}
  0x2b   :  { %s4553_s17 = scalar_lea.vmem %s59_s26, 1024  ;;  %p4558_p6 = scmp.lt.s32.totalorder %s59_s26, %s59_s26 }
  0x2c   :  { %p4554_p5 = scmp.ne.s32.totalorder %s59_s26, %s4553_s17  ;;  %p4559_p7 = scmp.lt.s32.totalorder %s4553_s17, %s4553_s17 }
  0x2e   :  { %p4560_p8 = por %p4559_p7, %p4558_p6 }
  0x30   :  { %p4561_p9 = pnand %p4560_p8, %p4554_p5 }
  0x32   :  { %4564 = shalt.err (!%p4561_p9)
}
  0x33   :  { %64 = dma.hbm_to_vmem [thread:$0]  %s5443_s7, 1024, %s59_s26, [#allocation6], %s4597_s2, %s4597_s2, %s4598_s18  }
  0x34   :  { %4587 = dma.done.wait [#allocation3], 256  }
  0x35   :  { %4588 = vsyncadd [#allocation3], 4294967040 }
  0x36   :  { %4589 = dma.done.wait [#allocation6], 1152  }
  0x37   :  { %4590 = vsyncadd [#allocation6], 4294966144  ;;  %vm91_vm0 = vcmask 261120   ;;  %v4709_v0 = vld [vmem:[#allocation2] sm:$0xff]  ;;  %v4711_v1 = vld [vmem:[#allocation2 + $0x8] sm:$0xff]  ;;  %s4600_s29 = smov 32   ;;  %v119_v30 = vlaneseq }
  0x38   :  { %v92_v2 = vsel %vm91_vm0, %v4709_v0, 0.0  ;;  %v95_v3 = vsel %vm91_vm0, %v4711_v1, 0.0  ;;  %v131_v14 = vld [vmem:[%s5439_s3] sm:$0xff]  ;;  %v132_v15 = vld [vmem:[%s5439_s3 + $0x8] sm:$0xff]  ;;  %v133_v16 = vld [vmem:[%s5439_s3 + $0x10] sm:$0xff]  ;;  %v4601_v50 = vmov 0.0  }
  0x39   :  { %93 = vadd.xlane.f32.xlu0 %v92_v2  ;;  %v4297_v17 = vpack.c.bf16 %v132_v15, %v131_v14  ;;  %v134_v18 = vld [vmem:[%s5439_s3 + $0x18] sm:$0xff]  ;;  %v4736_v20 = vld [vmem:[%s5437_s1 + $0x8] sm:$0xff]  ;;  %v4742_v21 = vld [vmem:[%s5437_s1] sm:$0xff]  ;;  %v4781_v34 = vshrl.u32 %v119_v30, 7  ;;  %4054 = vmatprep.subr.mxu0 %v4601_v50  ;;  %vm4602_vm1 = vmmov 0   ;;  %s4603_s26 = smov 96  }
  0x3a   :  { %v4301_v19 = vpack.c.bf16 %v134_v18, %v133_v16  ;;  %v4747_v22 = vld [vmem:[%s5437_s1 + $0x10] sm:$0xff]  ;;  %v4753_v23 = vld [vmem:[%s5437_s1 + $0x20] sm:$0xff]  ;;  %v4759_v24 = vld [vmem:[%s5437_s1 + $0x18] sm:$0xff]  ;;  %4056 = vmatprep.mubr.msk.f32.mxu0 %vm4602_vm1, %v4601_v50  ;;  %vm935_vm2 = vcmask 64512   ;;  %vm1887_vm3 = vcmask 523264  }
  0x3b   :  { %4298 = vmatprep.subr.bf16.mxu1 %v4297_v17  ;;  %v4765_v25 = vld [vmem:[%s5437_s1 + $0x30] sm:$0xff]  ;;  %v4771_v26 = vld [vmem:[%s5437_s1 + $0x28] sm:$0xff]  ;;  %v4778_v27 = vld [vmem:[%s5437_s1 + $0x38] sm:$0xff]  ;;  %v121_v36 = vsub.s32 0, %v4781_v34  ;;  %v127_v38 = vsub.s32 1, %v4781_v34 }
  0x3c   :  { %4300 = vmatpush3.bf16.msra.mxu1 %v4297_v17  ;;  %v4784_v37 = vld [vmem:[#allocation5] sm:$0xf]  ;;  %v3821_v52 = vld [vmem:[%s5440_s4] ss:$0 sm:$0xff] }
  0x3d   :  { %96 = vadd.xlane.f32.xlu0 %v95_v3  ;;  %4302 = vmatprep.subr.bf16.mxu1 %v4301_v19  ;;  %v122_v39 = vrot.slane %v4784_v37, %v121_v36  ;;  %v128_v42 = vrot.slane %v4784_v37, %v127_v38 }
  0x40   :  { %4304 = vmatpush3.bf16.msra.mxu1 %v4301_v19 }
  0x41   :  { %4044 = vmatprep.subr.mxu1 %v4601_v50 }
  0x53   :  { %239 = vrot.lane.b32.xlu0 %v4742_v21, %s4600_s29 }
  0x57   :  { %247 = vrot.lane.b32.xlu0 %v4753_v23, %s4600_s29 }
  0x5b   :  { %251 = vrot.lane.b32.xlu0 %v4765_v25, %s4600_s29 }
  0xc6   :  { %v94_v4 = vpop.xlane.xlu0 %93 }
  0xc7   :  { %v99_v5 = vmul.f32 0.03125, %v94_v4 }
  0xc9   :  { %v101_v6 = vsub.f32 %v4709_v0, %v99_v5 }
  0xca   :  { %v97_v7 = vpop.xlane.xlu0 %96 }
  0xcb   :  { %v100_v8 = vmul.f32 0.03125, %v97_v7  ;;  %v103_v9 = vmul.f32 %v101_v6, %v101_v6 }
  0xcd   :  { %v102_v10 = vsub.f32 %v4711_v1, %v100_v8  ;;  %v105_v11 = vsel %vm91_vm0, %v103_v9, 0.0 }
  0xce   :  { %106 = vadd.xlane.f32.xlu1 %v105_v11  ;;  %v4810_v55 = vpop.permute.xlu0 %239 }
  0xcf   :  { %v104_v12 = vmul.f32 %v102_v10, %v102_v10 }
  0xd1   :  { %v108_v13 = vsel %vm91_vm0, %v104_v12, 0.0 }
  0xd2   :  { %109 = vadd.xlane.f32.xlu1 %v108_v13  ;;  %v4824_v62 = vpop.permute.xlu0 %247 }
  0xe3   :  { %241 = vrot.lane.b32.xlu1 %v4736_v20, %s4600_s29 }
  0xe7   :  { %243 = vrot.lane.b32.xlu1 %v4747_v22, %s4600_s29 }
  0xeb   :  { %245 = vrot.lane.b32.xlu1 %v4759_v24, %s4600_s29 }
  0xef   :  { %249 = vrot.lane.b32.xlu1 %v4771_v26, %s4600_s29 }
  0xf3   :  { %253 = vrot.lane.b32.xlu1 %v4778_v27, %s4600_s29 }
 0x15b   :  { %v107_v28 = vpop.xlane.xlu1 %106 }
 0x15c   :  { %v111_v29 = vmul.f32 0.03125, %v107_v28 }
 0x15e   :  { %v113_v31 = vadd.f32 1e-05, %v111_v29 }
 0x15f   :  { %v110_v32 = vpop.xlane.xlu1 %109 }
 0x160   :  { %4413 = vrsqrt.f32 %v113_v31  ;;  %v112_v33 = vmul.f32 0.03125, %v110_v32 }
 0x162   :  { %v114_v35 = vadd.f32 1e-05, %v112_v33 }
 0x163   :  { %v4795_v49 = vpop.permute.xlu1 %241 }
 0x164   :  { %4415 = vrsqrt.f32 %v114_v35 }
 0x167   :  { %v4799_v51 = vpop.permute.xlu1 %243 }
 0x16a   :  { %v4414_v40 = vpop.eup %4413 }
 0x16b   :  { %v117_v41 = vmul.f32 %v4414_v40, %v101_v6  ;;  %v4808_v53 = vpop.permute.xlu1 %245  ;;  %v4838_v6 = vpop.permute.xlu0 %251 }
 0x16d   :  { %v123_v43 = vmul.f32 %v122_v39, %v117_v41 }
 0x16e   :  { %v4416_v44 = vpop.eup %4415 }
 0x16f   :  { %v118_v45 = vmul.f32 %v4416_v44, %v102_v10  ;;  %v129_v46 = vadd.f32 %v128_v42, %v123_v43  ;;  %v4821_v61 = vpop.permute.xlu1 %249 }
 0x171   :  { %v124_v47 = vmul.f32 %v122_v39, %v118_v45  ;;  %4041 = vmatprep.mubr.msk.f32.mxu1 %vm91_vm0, %v129_v46 }
 0x173   :  { %v130_v48 = vadd.f32 %v128_v42, %v124_v47  ;;  %v4834_v4 = vpop.permute.xlu1 %253 }
 0x175   :  { %4042 = vmatmul.mubr.msk.f32.vlgmr.msra.gmra.mrb[0].mxu1 %vm91_vm0, %v130_v48 }
 0x176   :  { %4046 = vmatprep.mubr.msk.f32.mxu1 %vm4602_vm1, %v4601_v50 }
 0x248   :  { %v4043_v54 = vpop.f32.mrb[0].mxu1 }
 0x249   :  { %v4812_v56 = vadd.f32 %v4043_v54, %v3821_v52  ;;  %v214_v57 = vpop.f32.mrb[1].mxu1 }
 0x24a   :  { %v4814_v58 = vadd.f32 %v3821_v52, %v214_v57 }
 0x24b   :  { %v264_v59 = vmul.f32 %v4795_v49, %v4812_v56  ;;  %v266_v63 = vmul.f32 %v4808_v53, %v4812_v56  ;;  %v268_v3 = vmul.f32 %v4821_v61, %v4812_v56  ;;  %v270_v7 = vmul.f32 %v4834_v4, %v4812_v56 }
 0x24c   :  { %v263_v60 = vmul.f32 %v4810_v55, %v4814_v58  ;;  %v265_v2 = vmul.f32 %v4799_v51, %v4814_v58  ;;  %v267_v5 = vmul.f32 %v4824_v62, %v4814_v58  ;;  %v269_v8 = vmul.f32 %v4838_v6, %v4814_v58 }
 0x24d   :  { %382 = vrot.lane.b32.xlu1 %v264_v59, %s4603_s26  ;;  %v223_v11 = vmul.f32 %v4814_v58, %v4742_v21  ;;  %v224_v14 = vmul.f32 %v4812_v56, %v4736_v20  ;;  %v225_v15 = vmul.f32 %v4814_v58, %v4747_v22  ;;  %v226_v18 = vmul.f32 %v4812_v56, %v4759_v24 }
 0x24e   :  { %304 = vrot.lane.b32.xlu0 %v263_v60, %s4603_s26  ;;  %v227_v19 = vmul.f32 %v4814_v58, %v4753_v23 }
 0x251   :  { %538 = vrot.lane.b32.xlu1 %v266_v63, %s4603_s26 }
 0x252   :  { %460 = vrot.lane.b32.xlu0 %v265_v2, %s4603_s26 }
 0x255   :  { %694 = vrot.lane.b32.xlu1 %v268_v3, %s4603_s26 }
 0x256   :  { %616 = vrot.lane.b32.xlu0 %v267_v5, %s4603_s26 }
 0x259   :  { %850 = vrot.lane.b32.xlu1 %v270_v7, %s4603_s26 }
 0x25a   :  { %772 = vrot.lane.b32.xlu0 %v269_v8, %s4603_s26 }
 0x25d   :  { %273 = vrot.lane.b32.xlu1 %v4736_v20, %s4594_s27 }
 0x25e   :  { %271 = vrot.lane.b32.xlu0 %v4742_v21, %s4594_s27 }
 0x261   :  { %275 = vrot.lane.b32.xlu1 %v4747_v22, %s4594_s27 }
 0x262   :  { %279 = vrot.lane.b32.xlu0 %v4753_v23, %s4594_s27  ;;  %v228_v23 = vmul.f32 %v4812_v56, %v4771_v26 }
 0x265   :  { %277 = vrot.lane.b32.xlu1 %v4759_v24, %s4594_s27  ;;  %v229_v24 = vmul.f32 %v4814_v58, %v4765_v25 }
 0x266   :  { %283 = vrot.lane.b32.xlu0 %v4765_v25, %s4594_s27 }
 0x269   :  { %281 = vrot.lane.b32.xlu1 %v4771_v26, %s4594_s27  ;;  %v230_v26 = vmul.f32 %v4812_v56, %v4778_v27 }
 0x26d   :  { %285 = vrot.lane.b32.xlu1 %v4778_v27, %s4594_s27 }
 0x2bf   :  { %v383_v9 = vpop.permute.xlu1 %382 }
 0x2c0   :  { %v305_v10 = vpop.permute.xlu0 %304 }
 0x2c1   :  { %4045 = vmatpush3.xpose.msk.msra.mxu1 %vm91_vm0, %v305_v10 }
 0x2c2   :  { %4049 = vmatprep.subr.mxu1 %v4601_v50 }
 0x2c3   :  { %v539_v12 = vpop.permute.xlu1 %538 }
 0x2c4   :  { %4047 = vmatmul.mubr.msk.f32.vlgmr.msra.gmra.mrb[2].mxu1 %vm91_vm0, %v223_v11  ;;  %v461_v13 = vpop.permute.xlu0 %460 }
 0x2c5   :  { %4050 = vmatpush3.xpose.msk.msra.mxu1 %vm91_vm0, %v383_v9  ;;  %4055 = vmatpush3.xpose.msk.msra.mxu0 %vm91_vm0, %v461_v13 }
 0x2c6   :  { %4051 = vmatprep.mubr.msk.f32.mxu1 %vm4602_vm1, %v4601_v50  ;;  %4059 = vmatprep.subr.mxu1 %v4601_v50 }
 0x2c7   :  { %4064 = vmatprep.subr.mxu0 %v4601_v50  ;;  %v695_v17 = vpop.permute.xlu1 %694 }
 0x2c8   :  { %4052 = vmatmul.mubr.msk.f32.vlgmr.msra.gmra.mrb[4].mxu1 %vm91_vm0, %v224_v14  ;;  %4057 = vmatmul.mubr.msk.f32.vlgmr.msra.gmra.mrb[0].mxu0 %vm91_vm0, %v225_v15  ;;  %v617_v16 = vpop.permute.xlu0 %616 }
 0x2c9   :  { %4060 = vmatpush3.xpose.msk.msra.mxu1 %vm91_vm0, %v539_v12  ;;  %4065 = vmatpush3.xpose.msk.msra.mxu0 %vm91_vm0, %v617_v16 }
 0x2ca   :  { %4061 = vmatprep.mubr.msk.f32.mxu1 %vm4602_vm1, %v4601_v50  ;;  %4066 = vmatprep.mubr.msk.f32.mxu0 %vm4602_vm1, %v4601_v50 }
 0x2cb   :  { %4069 = vmatprep.subr.mxu1 %v4601_v50  ;;  %4074 = vmatprep.subr.mxu0 %v4601_v50  ;;  %v851_v28 = vpop.permute.xlu1 %850 }
 0x2cc   :  { %4062 = vmatmul.mubr.msk.f32.vlgmr.msra.gmra.mrb[6].mxu1 %vm91_vm0, %v226_v18  ;;  %4067 = vmatmul.mubr.msk.f32.vlgmr.msra.gmra.mrb[2].mxu0 %vm91_vm0, %v227_v19  ;;  %v773_v20 = vpop.permute.xlu0 %772 }
 0x2cd   :  { %4070 = vmatpush3.xpose.msk.msra.mxu1 %vm91_vm0, %v695_v17  ;;  %4075 = vmatpush3.xpose.msk.msra.mxu0 %vm91_vm0, %v773_v20 }
 0x2ce   :  { %4071 = vmatprep.mubr.msk.f32.mxu1 %vm4602_vm1, %v4601_v50  ;;  %4076 = vmatprep.mubr.msk.f32.mxu0 %vm4602_vm1, %v4601_v50 }
 0x2cf   :  { %4079 = vmatprep.subr.mxu1 %v4601_v50  ;;  %4084 = vmatprep.subr.mxu0 %v4601_v50  ;;  %v4927_v7 = vpop.permute.xlu1 %273 }
 0x2d0   :  { %4072 = vmatmul.mubr.msk.f32.vlgmr.msra.gmra.mrb[8].mxu1 %vm91_vm0, %v228_v23  ;;  %4077 = vmatmul.mubr.msk.f32.vlgmr.msra.gmra.mrb[4].mxu0 %vm91_vm0, %v229_v24  ;;  %v296_v9 = vmul.f32 %v4927_v7, %v4812_v56  ;;  %v4939_v12 = vpop.permute.xlu0 %271 }
 0x2d1   :  { %4080 = vmatpush3.xpose.msk.msra.mxu1 %vm91_vm0, %v851_v28  ;;  %4081 = vmatprep.mubr.msk.f32.mxu1 %vm4602_vm1, %v4601_v50  ;;  %v295_v13 = vmul.f32 %v4939_v12, %v4814_v58 }
 0x2d2   :  { %4089 = vmatprep.subr.mxu1 %v4601_v50  ;;  %4086 = vmatprep.mubr.msk.f32.mxu0 %vm4602_vm1, %v4601_v50 }
 0x2d3   :  { %v4933_v10 = vpop.permute.xlu1 %275 }
 0x2d4   :  { %4082 = vmatmul.mubr.msk.f32.vlgmr.msra.gmra.mrb[10].mxu1 %vm91_vm0, %v230_v26  ;;  %v297_v11 = vmul.f32 %v4933_v10, %v4814_v58  ;;  %v4957_v20 = vpop.permute.xlu0 %279 }
 0x2d5   :  { %4091 = vmatprep.mubr.msk.f32.mxu1 %vm4602_vm1, %v4601_v50 }
 0x2d7   :  { %v4952_v18 = vpop.permute.xlu1 %277 }
 0x2d8   :  { %v298_v19 = vmul.f32 %v4952_v18, %v4812_v56  ;;  %v4961_v24 = vpop.permute.xlu0 %283 }
 0x2db   :  { %v4959_v23 = vpop.permute.xlu1 %281 }
 0x2df   :  { %v4963_v28 = vpop.permute.xlu1 %285 }
 0x397   :  { %v377_v25 = vpop.f32.mrb[2].mxu1 }
 0x398   :  { %v927_v29 = vmul.f32 0.35355338, %v377_v25  ;;  %v4048_v30 = vpop.f32.mrb[3].mxu1 }
 0x39a   :  { %v936_v31 = vsel %vm935_vm2, %v927_v29, -inf }
 0x39b   :  { %937 = vmax.xlane.f32.xlu0 %v936_v31  ;;  %v455_v32 = vpop.f32.mrb[4].mxu1  ;;  %v533_v33 = vpop.f32.mrb[0].mxu0 }
 0x39c   :  { %v928_v27 = vmul.f32 0.35355338, %v455_v32  ;;  %v929_v35 = vmul.f32 0.35355338, %v533_v33  ;;  %v4053_v39 = vpop.f32.mrb[5].mxu1  ;;  %v4058_v40 = vpop.f32.mrb[1].mxu0 }
 0x39e   :  { %v939_v41 = vsel %vm935_vm2, %v928_v27, -inf  ;;  %v942_v42 = vsel %vm935_vm2, %v929_v35, -inf }
 0x39f   :  { %940 = vmax.xlane.f32.xlu1 %v939_v41  ;;  %v611_v43 = vpop.f32.mrb[6].mxu1  ;;  %943 = vmax.xlane.f32.xlu0 %v942_v42  ;;  %v689_v44 = vpop.f32.mrb[2].mxu0 }
 0x3a0   :  { %v931_v45 = vmul.f32 0.35355338, %v689_v44  ;;  %v4063_v46 = vpop.f32.mrb[7].mxu1  ;;  %v4068_v47 = vpop.f32.mrb[3].mxu0  ;;  %v930_v48 = vmul.f32 0.35355338, %v611_v43 }
 0x3a2   :  { %v948_v52 = vsel %vm935_vm2, %v931_v45, -inf  ;;  %v945_v2 = vsel %vm935_vm2, %v930_v48, -inf }
 0x3a3   :  { %v767_v54 = vpop.f32.mrb[8].mxu1  ;;  %949 = vmax.xlane.f32.xlu0 %v948_v52  ;;  %v845_v57 = vpop.f32.mrb[4].mxu0 }
 0x3a4   :  { %v4073_v59 = vpop.f32.mrb[9].mxu1  ;;  %v4078_v60 = vpop.f32.mrb[5].mxu0  ;;  %v4924_v63 = vmul.f32 0.35355338, %v845_v57  ;;  %v4944_v14 = vmul.f32 0.35355338, %v767_v54 }
 0x3a6   :  { %v954_v8 = vsel %vm935_vm2, %v4924_v63, -inf  ;;  %v951_v16 = vsel %vm935_vm2, %v4944_v14, -inf }
 0x3a7   :  { %v923_v3 = vpop.f32.mrb[10].mxu1  ;;  %946 = vmax.xlane.f32.xlu0 %v945_v2 }
 0x3a8   :  { %v4083_v5 = vpop.f32.mrb[11].mxu1  ;;  %v4946_v15 = vmul.f32 0.35355338, %v923_v3 }
 0x3aa   :  { %v957_v17 = vsel %vm935_vm2, %v4946_v15, -inf }
 0x3ab   :  { %955 = vmax.xlane.f32.xlu0 %v954_v8 }
 0x3b0   :  { %1102 = vrot.lane.b32.xlu1 %v296_v9, %s4594_s27  ;;  %v300_v9 = vmul.f32 %v4959_v23, %v4812_v56 }
 0x3b4   :  { %1179 = vrot.lane.b32.xlu1 %v297_v11, %s4594_s27  ;;  %v299_v11 = vmul.f32 %v4957_v20, %v4814_v58 }
 0x3c1   :  { %1025 = vrot.lane.b32.xlu0 %v295_v13, %s4594_s27 }
 0x3d8   :  { %952 = vmax.xlane.f32.xlu1 %v951_v16 }
 0x3dc   :  { %958 = vmax.xlane.f32.xlu1 %v957_v17 }
 0x3ed   :  { %1256 = vrot.lane.b32.xlu1 %v298_v19, %s4594_s27 }
 0x428   :  { %v938_v26 = vpop.xlane.xlu0 %937 }
 0x429   :  { %v960_v25 = vsub.f32 %v927_v29, %v938_v26 }
 0x42b   :  { %v968_v30 = vmul.f32 1.442695, %v960_v25 }
 0x42c   :  { %v941_v31 = vpop.xlane.xlu1 %940  ;;  %v944_v32 = vpop.xlane.xlu0 %943 }
 0x42d   :  { %4417 = vpow2.f32 %v968_v30  ;;  %v961_v33 = vsub.f32 %v928_v27, %v941_v31  ;;  %v962_v39 = vsub.f32 %v929_v35, %v944_v32 }
 0x42f   :  { %v970_v40 = vmul.f32 1.442695, %v961_v33  ;;  %v972_v41 = vmul.f32 1.442695, %v962_v39 }
 0x430   :  { %v1103_v42 = vpop.permute.xlu1 %1102  ;;  %v950_v43 = vpop.xlane.xlu0 %949 }
 0x431   :  { %4419 = vpow2.f32 %v970_v40  ;;  %v964_v44 = vsub.f32 %v931_v45, %v950_v43  ;;  %4090 = vmatpush3.msra.mxu1 %v1103_v42  ;;  %v301_v42 = vmul.f32 %v4961_v24, %v4814_v58 }
 0x432   :  { %4421 = vpow2.f32 %v972_v41  ;;  %4099 = vmatprep.subr.mxu1 %v4601_v50  ;;  %v302_v41 = vmul.f32 %v4963_v28, %v4812_v56 }
 0x433   :  { %v976_v46 = vmul.f32 1.442695, %v964_v44 }
 0x434   :  { %v947_v47 = vpop.xlane.xlu0 %946  ;;  %v1180_v13 = vpop.permute.xlu1 %1179 }
 0x435   :  { %4423 = vpow2.f32 %v976_v46  ;;  %v963_v29 = vsub.f32 %v930_v48, %v947_v47 }
 0x437   :  { %v4418_v52 = vpop.eup %4417  ;;  %v974_v54 = vmul.f32 1.442695, %v963_v29 }
 0x438   :  { %v956_v57 = vpop.xlane.xlu0 %955  ;;  %v984_v27 = vsel %vm935_vm2, %v4418_v52, 0.0 }
 0x439   :  { %4425 = vpow2.f32 %v974_v54  ;;  %985 = vadd.xlane.f32.xlu0 %v984_v27  ;;  %v966_v16 = vsub.f32 %v4924_v63, %v956_v57 }
 0x43b   :  { %v4420_v35 = vpop.eup %4419  ;;  %v980_v25 = vmul.f32 1.442695, %v966_v16 }
 0x43c   :  { %v4967_v59 = vpop.eup %4421  ;;  %v1026_v60 = vpop.permute.xlu0 %1025  ;;  %v987_v45 = vsel %vm935_vm2, %v4420_v35, 0.0 }
 0x43d   :  { %988 = vadd.xlane.f32.xlu1 %v987_v45  ;;  %v990_v2 = vsel %vm935_vm2, %v4967_v59, 0.0  ;;  %4085 = vmatpush3.msra.mxu0 %v1026_v60 }
 0x43e   :  { %991 = vadd.xlane.f32.xlu0 %v990_v2  ;;  %4094 = vmatprep.subr.mxu0 %v4601_v50 }
 0x43f   :  { %v4973_v48 = vpop.eup %4423 }
 0x440   :  { %v996_v3 = vsel %vm935_vm2, %v4973_v48, 0.0 }
 0x442   :  { %997 = vadd.xlane.f32.xlu0 %v996_v3 }
 0x443   :  { %v4977_v5 = vpop.eup %4425 }
 0x444   :  { %v993_v8 = vsel %vm935_vm2, %v4977_v5, 0.0 }
 0x446   :  { %994 = vadd.xlane.f32.xlu0 %v993_v8 }
 0x44e   :  { %1410 = vrot.lane.b32.xlu1 %v300_v9, %s4594_s27 }
 0x45c   :  { %1333 = vrot.lane.b32.xlu0 %v299_v11, %s4594_s27 }
 0x465   :  { %v953_v17 = vpop.xlane.xlu1 %952 }
 0x466   :  { %v965_v19 = vsub.f32 %v4944_v14, %v953_v17 }
 0x468   :  { %v978_v26 = vmul.f32 1.442695, %v965_v19 }
 0x469   :  { %v959_v30 = vpop.xlane.xlu1 %958 }
 0x46a   :  { %4427 = vpow2.f32 %v978_v26  ;;  %v967_v31 = vsub.f32 %v4946_v15, %v959_v30 }
 0x46b   :  { %4429 = vpow2.f32 %v980_v25 }
 0x46c   :  { %v982_v32 = vmul.f32 1.442695, %v967_v31 }
 0x46d   :  { %v1257_v43 = vpop.permute.xlu1 %1256 }
 0x46e   :  { %4431 = vpow2.f32 %v982_v32 }
 0x474   :  { %v4990_v33 = vpop.eup %4427 }
 0x475   :  { %v999_v39 = vsel %vm935_vm2, %v4990_v33, 0.0  ;;  %v4994_v40 = vpop.eup %4429 }
 0x476   :  { %1000 = vadd.xlane.f32.xlu1 %v999_v39  ;;  %v1002_v15 = vsel %vm935_vm2, %v4994_v40, 0.0 }
 0x478   :  { %v4996_v63 = vpop.eup %4431 }
 0x479   :  { %v1005_v14 = vsel %vm935_vm2, %v4996_v63, 0.0 }
 0x47a   :  { %1006 = vadd.xlane.f32.xlu1 %v1005_v14  ;;  %v1649_v14 = vld [vmem:[%s5441_s5 + $0x18] sm:$0xff] }
 0x47b   :  { %1003 = vadd.xlane.f32.xlu0 %v1002_v15 }
 0x48b   :  { %1564 = vrot.lane.b32.xlu1 %v302_v41, %s4594_s27 }
 0x491   :  { %1487 = vrot.lane.b32.xlu0 %v301_v42, %s4594_s27 }
 0x4c6   :  { %v986_v44 = vpop.xlane.xlu0 %985 }
 0x4c7   :  { %4433 = vrcp.f32 %v986_v44 }
 0x4ca   :  { %v989_v46 = vpop.xlane.xlu1 %988 }
 0x4cb   :  { %4435 = vrcp.f32 %v989_v46  ;;  %v992_v47 = vpop.xlane.xlu0 %991 }
 0x4cc   :  { %4437 = vrcp.f32 %v992_v47 }
 0x4ce   :  { %v1411_v8 = vpop.permute.xlu1 %1410 }
 0x4cf   :  { %v998_v29 = vpop.xlane.xlu0 %997 }
 0x4d1   :  { %v4434_v54 = vpop.eup %4433 }
 0x4d2   :  { %v1016_v57 = vmul.f32 %v4434_v54, %v4418_v52 }
 0x4d3   :  { %v995_v27 = vpop.xlane.xlu0 %994 }
 0x4d4   :  { %4439 = vrcp.f32 %v995_v27  ;;  %4087 = vmatmul.mubr.msk.f32.vlgmr.msra.gmra.mrb[6].mxu0 %vm935_vm2, %v1016_v57 }
 0x4d5   :  { %v4436_v56 = vpop.eup %4435  ;;  %4441 = vrcp.f32 %v998_v29  ;;  %4095 = vmatpush3.msra.mxu0 %v1180_v13  ;;  %4096 = vmatprep.mubr.msk.f32.mxu0 %vm4602_vm1, %v4601_v50 }
 0x4d6   :  { %v1017_v58 = vmul.f32 %v4436_v56, %v4420_v35  ;;  %4104 = vmatprep.subr.mxu0 %v4601_v50  ;;  %v4438_v60 = vpop.eup %4437 }
 0x4d7   :  { %v1018_v52 = vmul.f32 %v4438_v60, %v4967_v59  ;;  %v1334_v45 = vpop.permute.xlu0 %1333 }
 0x4d8   :  { %4092 = vmatmul.mubr.msk.f32.vlgmr.msra.gmra.mrb[12].mxu1 %vm935_vm2, %v1017_v58 }
 0x4d9   :  { %4100 = vmatpush3.msra.mxu1 %v1257_v43  ;;  %4101 = vmatprep.mubr.msk.f32.mxu1 %vm4602_vm1, %v4601_v50  ;;  %v3848_v43 = vld [vmem:[%s5442_s6] ss:$0 sm:$0xff] }
 0x4da   :  { %4109 = vmatprep.subr.mxu1 %v4601_v50 }
 0x4dc   :  { %4097 = vmatmul.mubr.msk.f32.vlgmr.msra.gmra.mrb[6].mxu0 %vm935_vm2, %v1018_v52 }
 0x4dd   :  { %4105 = vmatpush3.msra.mxu0 %v1334_v45  ;;  %4106 = vmatprep.mubr.msk.f32.mxu0 %vm4602_vm1, %v4601_v50 }
 0x4de   :  { %v4440_v35 = vpop.eup %4439  ;;  %4114 = vmatprep.subr.mxu0 %v4601_v50 }
 0x4df   :  { %v4442_v2 = vpop.eup %4441  ;;  %v1019_v3 = vmul.f32 %v4440_v35, %v4977_v5  ;;  %v1646_v5 = vld [vmem:[%s5441_s5] sm:$0xff] }
 0x4e0   :  { %v1020_v59 = vmul.f32 %v4442_v2, %v4973_v48  ;;  %v1647_v48 = vld [vmem:[%s5441_s5 + $0x8] sm:$0xff] }
 0x4e1   :  { %4102 = vmatmul.mubr.msk.f32.vlgmr.msra.gmra.mrb[12].mxu1 %vm935_vm2, %v1019_v3  ;;  %v4305_v16 = vpack.c.bf16 %v1647_v48, %v1646_v5  ;;  %v1780_v5 = vld [vmem:[#allocation7 + $0x10] sm:$0xff]  ;;  %v1781_v48 = vld [vmem:[#allocation7 + $0x18] sm:$0xff] }
 0x4e2   :  { %4110 = vmatpush3.msra.mxu1 %v1411_v8  ;;  %4111 = vmatprep.mubr.msk.f32.mxu1 %vm4602_vm1, %v4601_v50 }
 0x4e3   :  { %4119 = vmatprep.subr.mxu1 %v4601_v50 }
 0x4e4   :  { %4107 = vmatmul.mubr.msk.f32.vlgmr.msra.gmra.mrb[6].mxu0 %vm935_vm2, %v1020_v59  ;;  %v1778_v59 = vld [vmem:[#allocation7] sm:$0xff] }
 0x4e5   :  { %4116 = vmatprep.mubr.msk.f32.mxu0 %vm4602_vm1, %v4601_v50 }
 0x503   :  { %v1001_v9 = vpop.xlane.xlu1 %1000 }
 0x504   :  { %4443 = vrcp.f32 %v1001_v9  ;;  %v1779_v9 = vld [vmem:[#allocation7 + $0x8] sm:$0xff] }
 0x507   :  { %v1007_v11 = vpop.xlane.xlu1 %1006 }
 0x508   :  { %v1004_v13 = vpop.xlane.xlu0 %1003 }
 0x509   :  { %4445 = vrcp.f32 %v1004_v13  ;;  %v4317_v13 = vpack.c.bf16 %v1781_v48, %v1780_v5  ;;  %v3854_v5 = vld [vmem:[%s5446_s10] ss:$0 sm:$0xff] }
 0x50a   :  { %4447 = vrcp.f32 %v1007_v11  ;;  %v4313_v11 = vpack.c.bf16 %v1779_v9, %v1778_v59 }
 0x50b   :  { %v1565_v25 = vpop.permute.xlu1 %1564 }
 0x50c   :  { %v1488_v17 = vpop.permute.xlu0 %1487 }
 0x50d   :  { %4115 = vmatpush3.msra.mxu0 %v1488_v17  ;;  %v1873_v17 = vld [vmem:[%s5445_s9 + $0x8] sm:$0xff] }
 0x50e   :  { %v4444_v19 = vpop.eup %4443  ;;  %4306 = vmatprep.subr.bf16.mxu0 %v4305_v16 }
 0x50f   :  { %v1021_v26 = vmul.f32 %v4444_v19, %v4990_v33  ;;  %v1648_v33 = vld [vmem:[%s5441_s5 + $0x10] sm:$0xff] }
 0x510   :  { %v4309_v15 = vpack.c.bf16 %v1649_v14, %v1648_v33  ;;  %v1874_v19 = vld [vmem:[%s5445_s9 + $0x10] sm:$0xff] }
 0x511   :  { %4112 = vmatmul.mubr.msk.f32.vlgmr.msra.gmra.mrb[12].mxu1 %vm935_vm2, %v1021_v26 }
 0x512   :  { %4120 = vmatpush3.msra.mxu1 %v1565_v25  ;;  %4121 = vmatprep.mubr.msk.f32.mxu1 %vm4602_vm1, %v4601_v50  ;;  %v1875_v25 = vld [vmem:[%s5445_s9 + $0x18] sm:$0xff] }
 0x513   :  { %v4446_v30 = vpop.eup %4445  ;;  %4314 = vmatprep.subr.bf16.mxu1 %v4313_v11 }
 0x514   :  { %v4448_v31 = vpop.eup %4447  ;;  %v1022_v32 = vmul.f32 %v4446_v30, %v4994_v40  ;;  %v4325_v30 = vpack.c.bf16 %v1875_v25, %v1874_v19 }
 0x515   :  { %v1023_v39 = vmul.f32 %v4448_v31, %v4996_v63  ;;  %v1876_v31 = vld [vmem:[%s5445_s9 + $0x20] sm:$0xff] }
 0x516   :  { %4117 = vmatmul.mubr.msk.f32.vlgmr.msra.gmra.mrb[6].mxu0 %vm935_vm2, %v1022_v32  ;;  %v1877_v32 = vld [vmem:[%s5445_s9 + $0x28] sm:$0xff] }
 0x517   :  { %4308 = vmatpush3.bf16.msra.mxu0 %v4305_v16  ;;  %v1872_v16 = vld [vmem:[%s5445_s9] sm:$0xff] }
 0x518   :  { %4310 = vmatprep.subr.bf16.mxu0 %v4309_v15  ;;  %v4321_v26 = vpack.c.bf16 %v1873_v17, %v1872_v16 }
 0x519   :  { %4122 = vmatmul.mubr.msk.f32.vlgmr.msra.gmra.mrb[12].mxu1 %vm935_vm2, %v1023_v39  ;;  %v4329_v39 = vpack.c.bf16 %v1877_v32, %v1876_v31 }
 0x51a   :  { %4316 = vmatpush3.bf16.msra.mxu1 %v4313_v11 }
 0x51b   :  { %4312 = vmatpush3.bf16.msra.mxu0 %v4309_v15  ;;  %4318 = vmatprep.subr.bf16.mxu1 %v4317_v13 }
 0x51c   :  { %4322 = vmatprep.subr.bf16.mxu0 %v4321_v26 }
 0x51e   :  { %4320 = vmatpush3.bf16.msra.mxu1 %v4317_v13 }
 0x5e9   :  { %v1559_v41 = vpop.f32.mrb[6].mxu0 }
 0x5ea   :  { %v4118_v40 = vpop.f32.mrb[7].mxu0  ;;  %4132 = vmatprep.mubr.msk.f32.mxu0 %vm91_vm0, %v1559_v41 }
 0x5ec   :  { %v1636_v42 = vpop.f32.mrb[12].mxu1 }
 0x5ed   :  { %v4123_v63 = vpop.f32.mrb[13].mxu1  ;;  %4133 = vmatmul.mubr.msk.f32.vlgmr.msra.gmra.mrb[8].mxu0 %vm91_vm0, %v1636_v42 }
 0x5ee   :  { %4324 = vmatpush3.bf16.msra.mxu0 %v4321_v26  ;;  %v1768_v63 = vsub.s32 2, %v4781_v34 }
 0x5ef   :  { %4326 = vmatprep.subr.bf16.mxu0 %v4325_v30 }
 0x5f2   :  { %4328 = vmatpush3.bf16.msra.mxu0 %v4325_v30 }
 0x5f3   :  { %4330 = vmatprep.subr.bf16.mxu0 %v4329_v39 }
 0x5f6   :  { %4332 = vmatpush3.bf16.msra.mxu0 %v4329_v39 }
 0x6c0   :  { %v4134_v44 = vpop.f32.mrb[8].mxu0 }
 0x6c1   :  { %v1735_v46 = vadd.f32 %v4134_v44, %v3848_v43  ;;  %v1729_v47 = vpop.f32.mrb[9].mxu0  ;;  %v1769_v44 = vrot.slane %v4784_v37, %v1768_v63 }
 0x6c2   :  { %v1730_v29 = vadd.f32 %v3848_v43, %v1729_v47  ;;  %v1774_v43 = vsub.s32 3, %v4781_v34  ;;  %v3908_v34 = vld [vmem:[%s5445_s9 + $0x78] sm:$0xff] }
 0x6c3   :  { %v5056_v54 = vadd.f32 %v1735_v46, %v4711_v1 }
 0x6c4   :  { %v5059_v57 = vadd.f32 %v1730_v29, %v4709_v0  ;;  %v1775_v29 = vrot.slane %v4784_v37, %v1774_v43  ;;  %v3851_v37 = vld [vmem:[%s5444_s8] ss:$0 sm:$0xff] }
 0x6c5   :  { %v1743_v27 = vsel %vm91_vm0, %v5056_v54, 0.0 }
 0x6c6   :  { %1744 = vadd.xlane.f32.xlu1 %v1743_v27  ;;  %v1740_v56 = vsel %vm91_vm0, %v5059_v57, 0.0 }
 0x6c7   :  { %1741 = vadd.xlane.f32.xlu0 %v1740_v56 }
 0x753   :  { %v1745_v58 = vpop.xlane.xlu1 %1744 }
 0x754   :  { %v1747_v60 = vmul.f32 0.03125, %v1745_v58  ;;  %v1742_v52 = vpop.xlane.xlu0 %1741 }
 0x755   :  { %v1746_v45 = vmul.f32 0.03125, %v1742_v52 }
 0x756   :  { %v1749_v35 = vsub.f32 %v5056_v54, %v1747_v60 }
 0x757   :  { %v1748_v1 = vsub.f32 %v5059_v57, %v1746_v45 }
 0x758   :  { %v1751_v3 = vmul.f32 %v1749_v35, %v1749_v35 }
 0x759   :  { %v1750_v2 = vmul.f32 %v1748_v1, %v1748_v1 }
 0x75a   :  { %v1755_v8 = vsel %vm91_vm0, %v1751_v3, 0.0 }
 0x75b   :  { %v1752_v0 = vsel %vm91_vm0, %v1750_v2, 0.0  ;;  %v1878_v2 = vld [vmem:[%s5445_s9 + $0x30] sm:$0xff] }
 0x75c   :  { %1753 = vadd.xlane.f32.xlu0 %v1752_v0 }
 0x760   :  { %1756 = vadd.xlane.f32.xlu0 %v1755_v8 }
 0x7e9   :  { %v1754_v33 = vpop.xlane.xlu0 %1753 }
 0x7ea   :  { %v1758_v14 = vmul.f32 0.03125, %v1754_v33 }
 0x7ec   :  { %v1760_v15 = vadd.f32 1e-05, %v1758_v14 }
 0x7ed   :  { %v1757_v41 = vpop.xlane.xlu0 %1756 }
 0x7ee   :  { %4449 = vrsqrt.f32 %v1760_v15  ;;  %v1759_v40 = vmul.f32 0.03125, %v1757_v41 }
 0x7f0   :  { %v1761_v42 = vadd.f32 1e-05, %v1759_v40 }
 0x7f2   :  { %4451 = vrsqrt.f32 %v1761_v42  ;;  %v3857_v42 = vld [vmem:[%s5439_s3 + $0x20] sm:$0xff] }
 0x7f8   :  { %v4450_v46 = vpop.eup %4449 }
 0x7f9   :  { %v1764_v47 = vmul.f32 %v4450_v46, %v1748_v1  ;;  %v1879_v1 = vld [vmem:[%s5445_s9 + $0x38] sm:$0xff]  ;;  %v3859_v46 = vld [vmem:[%s5439_s3 + $0x30] sm:$0xff] }
 0x7fa   :  { %v4333_v0 = vpack.c.bf16 %v1879_v1, %v1878_v2  ;;  %v5141_v1 = vld [vmem:[#allocation5 + $0x4] sm:$0xf] }
 0x7fb   :  { %v1770_v27 = vmul.f32 %v1769_v44, %v1764_v47 }
 0x7fc   :  { %v4452_v56 = vpop.eup %4451  ;;  %4334 = vmatprep.subr.bf16.mxu0 %v4333_v0 }
 0x7fd   :  { %v1765_v58 = vmul.f32 %v4452_v56, %v1749_v35  ;;  %v1776_v60 = vadd.f32 %v1775_v29, %v1770_v27  ;;  %4336 = vmatpush3.bf16.msra.mxu0 %v4333_v0  ;;  %v2002_v0 = vrot.slane %v5141_v1, %v121_v36  ;;  %v3862_v36 = vld [vmem:[%s5440_s4 + $0x1] ss:$0 sm:$0xff] }
 0x7fe   :  { %4186 = vmatprep.subr.mxu0 %v4601_v50 }
 0x7ff   :  { %v1771_v52 = vmul.f32 %v1769_v44, %v1765_v58  ;;  %4143 = vmatprep.mubr.msk.f32.mxu1 %vm91_vm0, %v1776_v60  ;;  %v3858_v44 = vld [vmem:[%s5439_s3 + $0x28] sm:$0xff] }
 0x800   :  { %v4337_v47 = vpack.c.bf16 %v3858_v44, %v3857_v42  ;;  %v4496_v44 = vld [vmem:[%s5437_s1 + $0x30] sm:$0xff] }
 0x801   :  { %v1777_v45 = vadd.f32 %v1775_v29, %v1771_v52  ;;  %v3860_v29 = vld [vmem:[%s5439_s3 + $0x38] sm:$0xff] }
 0x802   :  { %v4341_v27 = vpack.c.bf16 %v3860_v29, %v3859_v46  ;;  %4338 = vmatprep.subr.bf16.mxu1 %v4337_v47 }
 0x803   :  { %4144 = vmatmul.mubr.msk.f32.vlgmr.msra.gmra.mrb[14].mxu1 %vm91_vm0, %v1777_v45 }
 0x804   :  { %4340 = vmatpush3.bf16.msra.mxu1 %v4337_v47  ;;  %v4497_v47 = vld [vmem:[%s5437_s1 + $0x28] sm:$0xff] }
 0x805   :  { %4342 = vmatprep.subr.bf16.mxu1 %v4341_v27 }
 0x808   :  { %4344 = vmatpush3.bf16.msra.mxu1 %v4341_v27 }
 0x809   :  { %4176 = vmatprep.subr.mxu1 %v4601_v50 }
 0x8d6   :  { %v4145_v35 = vpop.f32.mrb[14].mxu1 }
 0x8d7   :  { %v1867_v3 = vadd.f32 %v4145_v35, %v3851_v37  ;;  %v1861_v8 = vpop.f32.mrb[15].mxu1 }
 0x8d8   :  { %v1862_v59 = vadd.f32 %v3851_v37, %v1861_v8 }
 0x8d9   :  { %v1871_v11 = vmax.f32 %v1867_v3, 0.0  ;;  %v2008_v3 = vrot.slane %v5141_v1, %v127_v38 }
 0x8da   :  { %v1870_v9 = vmax.f32 %v1862_v59, 0.0 }
 0x8dc   :  { %4162 = vmatprep.mubr.msk.f32.mxu0 %vm1887_vm3, %v1870_v9 }
 0x8dd   :  { %4163 = vmatmul.mubr.msk.f32.vlgmr.msra.gmra.mrb[10].mxu0 %vm1887_vm3, %v1871_v11 }
 0x8de   :  { %4188 = vmatprep.mubr.msk.f32.mxu0 %vm4602_vm1, %v4601_v50 }
 0x9b0   :  { %v4164_v48 = vpop.f32.mrb[10].mxu0 }
 0x9b1   :  { %v1966_v13 = vadd.f32 %v4164_v48, %v3854_v5  ;;  %v1960_v16 = vpop.f32.mrb[11].mxu0 }
 0x9b2   :  { %v1961_v17 = vadd.f32 %v3854_v5, %v1960_v16 }
 0x9b3   :  { %v5115_v19 = vadd.f32 %v1966_v13, %v5056_v54 }
 0x9b4   :  { %v5118_v26 = vadd.f32 %v1961_v17, %v5059_v57 }
 0x9b5   :  { %v1976_v25 = vsel %vm91_vm0, %v5115_v19, 0.0 }
 0x9b6   :  { %1977 = vadd.xlane.f32.xlu1 %v1976_v25  ;;  %v1973_v30 = vsel %vm91_vm0, %v5118_v26, 0.0 }
 0x9b7   :  { %1974 = vadd.xlane.f32.xlu0 %v1973_v30 }
 0xa43   :  { %v1978_v31 = vpop.xlane.xlu1 %1977 }
 0xa44   :  { %v1980_v32 = vmul.f32 0.03125, %v1978_v31  ;;  %v1975_v39 = vpop.xlane.xlu0 %1974 }
 0xa45   :  { %v1979_v33 = vmul.f32 0.03125, %v1975_v39 }
 0xa46   :  { %v1982_v14 = vsub.f32 %v5115_v19, %v1980_v32 }
 0xa47   :  { %v1981_v54 = vsub.f32 %v5118_v26, %v1979_v33 }
 0xa48   :  { %v1984_v15 = vmul.f32 %v1982_v14, %v1982_v14 }
 0xa49   :  { %v1983_v41 = vmul.f32 %v1981_v54, %v1981_v54 }
 0xa4a   :  { %v1988_v57 = vsel %vm91_vm0, %v1984_v15, 0.0 }
 0xa4b   :  { %1989 = vadd.xlane.f32.xlu1 %v1988_v57  ;;  %v1985_v40 = vsel %vm91_vm0, %v1983_v41, 0.0  ;;  %v4495_v41 = vld [vmem:[%s5437_s1 + $0x18] sm:$0xff] }
 0xa4c   :  { %1986 = vadd.xlane.f32.xlu0 %v1985_v40 }
 0xad8   :  { %v1990_v56 = vpop.xlane.xlu1 %1989 }
 0xad9   :  { %v1992_v58 = vmul.f32 0.03125, %v1990_v56  ;;  %v1987_v60 = vpop.xlane.xlu0 %1986  ;;  %v4498_v56 = vld [vmem:[%s5437_s1 + $0x38] sm:$0xff] }
 0xada   :  { %v1991_v52 = vmul.f32 0.03125, %v1987_v60 }
 0xadb   :  { %v1994_v45 = vadd.f32 1e-05, %v1992_v58 }
 0xadc   :  { %v1993_v2 = vadd.f32 1e-05, %v1991_v52 }
 0xadd   :  { %4453 = vrsqrt.f32 %v1994_v45 }
 0xade   :  { %4455 = vrsqrt.f32 %v1993_v2 }
 0xae7   :  { %v4454_v37 = vpop.eup %4453 }
 0xae8   :  { %v4456_v35 = vpop.eup %4455  ;;  %v1998_v8 = vmul.f32 %v4454_v37, %v1982_v14 }
 0xae9   :  { %v1997_v59 = vmul.f32 %v4456_v35, %v1981_v54 }
 0xaea   :  { %v2004_v9 = vmul.f32 %v2002_v0, %v1998_v8 }
 0xaeb   :  { %v2003_v11 = vmul.f32 %v2002_v0, %v1997_v59 }
 0xaec   :  { %v2010_v5 = vadd.f32 %v2008_v3, %v2004_v9 }
 0xaed   :  { %v2009_v48 = vadd.f32 %v2008_v3, %v2003_v11 }
 0xaef   :  { %4173 = vmatprep.mubr.msk.f32.mxu1 %vm91_vm0, %v2009_v48 }
 0xaf0   :  { %4174 = vmatmul.mubr.msk.f32.vlgmr.msra.gmra.mrb[16].mxu1 %vm91_vm0, %v2010_v5 }
 0xaf1   :  { %4178 = vmatprep.mubr.msk.f32.mxu1 %vm4602_vm1, %v4601_v50 }
 0xbc3   :  { %v4175_v13 = vpop.f32.mrb[16].mxu1 }
 0xbc4   :  { %v5156_v16 = vadd.f32 %v4175_v13, %v3862_v36  ;;  %v2096_v38 = vpop.f32.mrb[17].mxu1 }
 0xbc5   :  { %v5158_v17 = vadd.f32 %v3862_v36, %v2096_v38 }
 0xbc6   :  { %v2114_v25 = vmul.f32 %v5156_v16, %v4795_v49  ;;  %v2116_v49 = vmul.f32 %v5156_v16, %v4808_v53  ;;  %v2108_v57 = vmul.f32 %v4495_v41, %v5156_v16  ;;  %v2110_v29 = vmul.f32 %v4497_v47, %v5156_v16 }
 0xbc7   :  { %v2113_v30 = vmul.f32 %v5158_v17, %v4810_v55  ;;  %v2115_v31 = vmul.f32 %v5158_v17, %v4799_v51  ;;  %v2117_v32 = vmul.f32 %v5158_v17, %v4824_v62  ;;  %v2119_v55 = vmul.f32 %v5158_v17, %v4838_v6 }
 0xbc8   :  { %2208 = vrot.lane.b32.xlu1 %v2114_v25, %s4603_s26  ;;  %v2118_v51 = vmul.f32 %v5156_v16, %v4821_v61  ;;  %v2120_v62 = vmul.f32 %v5156_v16, %v4834_v4  ;;  %v2105_v53 = vmul.f32 %v5158_v17, %v4742_v21  ;;  %v2107_v4 = vmul.f32 %v5158_v17, %v4747_v22  ;;  %v4493_v21 = vld [vmem:[%s5437_s1 + $0x8] sm:$0xff]  ;;  %v4494_v22 = vld [vmem:[%s5437_s1 + $0x20] sm:$0xff] }
 0xbc9   :  { %2130 = vrot.lane.b32.xlu0 %v2113_v30, %s4603_s26  ;;  %v2106_v14 = vmul.f32 %v4493_v21, %v5156_v16  ;;  %v2109_v15 = vmul.f32 %v4494_v22, %v5158_v17  ;;  %v2111_v46 = vmul.f32 %v4496_v44, %v5158_v17  ;;  %v2112_v58 = vmul.f32 %v4498_v56, %v5156_v16 }
 0xbcc   :  { %2286 = vrot.lane.b32.xlu1 %v2115_v31, %s4603_s26 }
 0xbcd   :  { %2442 = vrot.lane.b32.xlu0 %v2117_v32, %s4603_s26 }
 0xbd0   :  { %2364 = vrot.lane.b32.xlu1 %v2116_v49, %s4603_s26 }
 0xbd1   :  { %2598 = vrot.lane.b32.xlu0 %v2119_v55, %s4603_s26 }
 0xbd4   :  { %2520 = vrot.lane.b32.xlu1 %v2118_v51, %s4603_s26 }
 0xbd8   :  { %2676 = vrot.lane.b32.xlu1 %v2120_v62, %s4603_s26 }
 0xc3a   :  { %v2209_v39 = vpop.permute.xlu1 %2208 }
 0xc3b   :  { %v2131_v33 = vpop.permute.xlu0 %2130 }
 0xc3c   :  { %4177 = vmatpush3.xpose.msk.msra.mxu1 %vm91_vm0, %v2131_v33 }
 0xc3d   :  { %4181 = vmatprep.subr.mxu1 %v4601_v50 }
 0xc3e   :  { %v2287_v6 = vpop.permute.xlu1 %2286 }
 0xc3f   :  { %4187 = vmatpush3.xpose.msk.msra.mxu0 %vm91_vm0, %v2287_v6  ;;  %4179 = vmatmul.mubr.msk.f32.vlgmr.msra.gmra.mrb[18].mxu1 %vm91_vm0, %v2105_v53  ;;  %v2443_v61 = vpop.permute.xlu0 %2442  ;;  %v2122_v6 = vmul.f32 %v5156_v16, %v4927_v7  ;;  %v2124_v7 = vmul.f32 %v5156_v16, %v4952_v18 }
 0xc40   :  { %4182 = vmatpush3.xpose.msk.msra.mxu1 %vm91_vm0, %v2209_v39  ;;  %4196 = vmatprep.subr.mxu0 %v4601_v50 }
 0xc41   :  { %4183 = vmatprep.mubr.msk.f32.mxu1 %vm4602_vm1, %v4601_v50  ;;  %4191 = vmatprep.subr.mxu1 %v4601_v50 }
 0xc42   :  { %v2365_v54 = vpop.permute.xlu1 %2364  ;;  %4189 = vmatmul.mubr.msk.f32.vlgmr.msra.gmra.mrb[12].mxu0 %vm91_vm0, %v2107_v4  ;;  %v2121_v4 = vmul.f32 %v5158_v17, %v4939_v12 }
 0xc43   :  { %4184 = vmatmul.mubr.msk.f32.vlgmr.msra.gmra.mrb[20].mxu1 %vm91_vm0, %v2106_v14  ;;  %4197 = vmatpush3.xpose.msk.msra.mxu0 %vm91_vm0, %v2443_v61  ;;  %v2599_v40 = vpop.permute.xlu0 %2598  ;;  %v2123_v61 = vmul.f32 %v5158_v17, %v4933_v10 }
 0xc44   :  { %4192 = vmatpush3.xpose.msk.msra.mxu1 %vm91_vm0, %v2365_v54  ;;  %4198 = vmatprep.mubr.msk.f32.mxu0 %vm4602_vm1, %v4601_v50 }
 0xc45   :  { %4193 = vmatprep.mubr.msk.f32.mxu1 %vm4602_vm1, %v4601_v50  ;;  %4206 = vmatprep.subr.mxu0 %v4601_v50 }
 0xc46   :  { %v2521_v42 = vpop.permute.xlu1 %2520  ;;  %4199 = vmatmul.mubr.msk.f32.vlgmr.msra.gmra.mrb[14].mxu0 %vm91_vm0, %v2109_v15  ;;  %4201 = vmatprep.subr.mxu1 %v4601_v50 }
 0xc47   :  { %4194 = vmatmul.mubr.msk.f32.vlgmr.msra.gmra.mrb[22].mxu1 %vm91_vm0, %v2108_v57  ;;  %4207 = vmatpush3.xpose.msk.msra.mxu0 %vm91_vm0, %v2599_v40 }
 0xc48   :  { %4202 = vmatpush3.xpose.msk.msra.mxu1 %vm91_vm0, %v2521_v42  ;;  %4208 = vmatprep.mubr.msk.f32.mxu0 %vm4602_vm1, %v4601_v50 }
 0xc49   :  { %4203 = vmatprep.mubr.msk.f32.mxu1 %vm4602_vm1, %v4601_v50  ;;  %4211 = vmatprep.subr.mxu1 %v4601_v50 }
 0xc4a   :  { %v2677_v27 = vpop.permute.xlu1 %2676  ;;  %4209 = vmatmul.mubr.msk.f32.vlgmr.msra.gmra.mrb[16].mxu0 %vm91_vm0, %v2111_v46  ;;  %4216 = vmatprep.subr.mxu0 %v4601_v50 }
 0xc4b   :  { %4204 = vmatmul.mubr.msk.f32.vlgmr.msra.gmra.mrb[24].mxu1 %vm91_vm0, %v2110_v29  ;;  %4218 = vmatprep.mubr.msk.f32.mxu0 %vm4602_vm1, %v4601_v50 }
 0xc4c   :  { %4212 = vmatpush3.xpose.msk.msra.mxu1 %vm91_vm0, %v2677_v27  ;;  %4213 = vmatprep.mubr.msk.f32.mxu1 %vm4602_vm1, %v4601_v50 }
 0xc4d   :  { %4221 = vmatprep.subr.mxu1 %v4601_v50 }
 0xc4f   :  { %4214 = vmatmul.mubr.msk.f32.vlgmr.msra.gmra.mrb[26].mxu1 %vm91_vm0, %v2112_v58 }
 0xc50   :  { %4223 = vmatprep.mubr.msk.f32.mxu1 %vm4602_vm1, %v4601_v50 }
 0xd12   :  { %v2203_v60 = vpop.f32.mrb[18].mxu1 }
 0xd13   :  { %v2753_v52 = vmul.f32 0.35355338, %v2203_v60  ;;  %v4180_v45 = vpop.f32.mrb[19].mxu1 }
 0xd15   :  { %v2359_v2 = vpop.f32.mrb[12].mxu0  ;;  %v2761_v0 = vsel %vm935_vm2, %v2753_v52, -inf }
 0xd16   :  { %v2755_v37 = vmul.f32 0.35355338, %v2359_v2  ;;  %v4190_v35 = vpop.f32.mrb[13].mxu0  ;;  %2762 = vmax.xlane.f32.xlu0 %v2761_v0  ;;  %v2281_v3 = vpop.f32.mrb[20].mxu1 }
 0xd17   :  { %v2754_v8 = vmul.f32 0.35355338, %v2281_v3  ;;  %v4185_v59 = vpop.f32.mrb[21].mxu1  ;;  %v2125_v35 = vmul.f32 %v5158_v17, %v4957_v20 }
 0xd18   :  { %v2767_v9 = vsel %vm935_vm2, %v2755_v37, -inf }
 0xd19   :  { %v2515_v11 = vpop.f32.mrb[14].mxu0  ;;  %v2764_v5 = vsel %vm935_vm2, %v2754_v8, -inf }
 0xd1a   :  { %v5255_v48 = vmul.f32 0.35355338, %v2515_v11  ;;  %v4200_v36 = vpop.f32.mrb[15].mxu0  ;;  %2768 = vmax.xlane.f32.xlu0 %v2767_v9  ;;  %2765 = vmax.xlane.f32.xlu1 %v2764_v5  ;;  %v2437_v13 = vpop.f32.mrb[22].mxu1 }
 0xd1b   :  { %v4195_v38 = vpop.f32.mrb[23].mxu1  ;;  %v5259_v30 = vmul.f32 0.35355338, %v2437_v13 }
 0xd1c   :  { %v2773_v25 = vsel %vm935_vm2, %v5255_v48, -inf }
 0xd1d   :  { %v2671_v31 = vpop.f32.mrb[16].mxu0  ;;  %v2770_v62 = vsel %vm935_vm2, %v5259_v30, -inf }
 0xd1e   :  { %v4210_v32 = vpop.f32.mrb[17].mxu0  ;;  %2774 = vmax.xlane.f32.xlu0 %v2773_v25  ;;  %v2593_v49 = vpop.f32.mrb[24].mxu1  ;;  %v2759_v51 = vmul.f32 0.35355338, %v2671_v31 }
 0xd1f   :  { %v4205_v55 = vpop.f32.mrb[25].mxu1  ;;  %v2758_v21 = vmul.f32 0.35355338, %v2593_v49 }
 0xd20   :  { %v2779_v53 = vsel %vm935_vm2, %v2759_v51, -inf }
 0xd21   :  { %v2776_v54 = vsel %vm935_vm2, %v2758_v21, -inf }
 0xd22   :  { %2771 = vmax.xlane.f32.xlu0 %v2770_v62  ;;  %v2749_v39 = vpop.f32.mrb[26].mxu1 }
 0xd23   :  { %v4215_v33 = vpop.f32.mrb[27].mxu1  ;;  %v2760_v14 = vmul.f32 0.35355338, %v2749_v39 }
 0xd25   :  { %v2782_v22 = vsel %vm935_vm2, %v2760_v14, -inf }
 0xd26   :  { %2780 = vmax.xlane.f32.xlu0 %v2779_v53 }
 0xd2b   :  { %2927 = vrot.lane.b32.xlu1 %v2122_v6, %s4594_s27  ;;  %v2128_v6 = vmul.f32 %v5156_v16, %v4963_v28 }
 0xd2f   :  { %3004 = vrot.lane.b32.xlu1 %v2123_v61, %s4594_s27  ;;  %v2127_v61 = vmul.f32 %v5158_v17, %v4961_v24 }
 0xd3c   :  { %2850 = vrot.lane.b32.xlu0 %v2121_v4, %s4594_s27 }
 0xd53   :  { %2777 = vmax.xlane.f32.xlu1 %v2776_v54 }
 0xd57   :  { %2783 = vmax.xlane.f32.xlu1 %v2782_v22 }
 0xd68   :  { %3081 = vrot.lane.b32.xlu1 %v2124_v7, %s4594_s27 }
 0xda3   :  { %v2763_v10 = vpop.xlane.xlu0 %2762 }
 0xda4   :  { %v2785_v15 = vsub.f32 %v2753_v52, %v2763_v10 }
 0xda6   :  { %v2793_v41 = vmul.f32 1.442695, %v2785_v15 }
 0xda7   :  { %v2769_v57 = vpop.xlane.xlu0 %2768  ;;  %v2766_v12 = vpop.xlane.xlu1 %2765 }
 0xda8   :  { %4457 = vpow2.f32 %v2793_v41  ;;  %v2787_v40 = vsub.f32 %v2755_v37, %v2769_v57  ;;  %v2786_v42 = vsub.f32 %v2754_v8, %v2766_v12  ;;  %v2126_v37 = vmul.f32 %v5156_v16, %v4959_v23 }
 0xdaa   :  { %v2797_v44 = vmul.f32 1.442695, %v2787_v40  ;;  %v2795_v46 = vmul.f32 1.442695, %v2786_v42 }
 0xdab   :  { %v2775_v47 = vpop.xlane.xlu0 %2774  ;;  %v2928_v29 = vpop.permute.xlu1 %2927 }
 0xdac   :  { %4459 = vpow2.f32 %v2797_v44  ;;  %4222 = vmatpush3.msra.mxu1 %v2928_v29  ;;  %v2789_v3 = vsub.f32 %v5255_v48, %v2775_v47 }
 0xdad   :  { %4461 = vpow2.f32 %v2795_v46  ;;  %4231 = vmatprep.subr.mxu1 %v4601_v50 }
 0xdae   :  { %v2801_v59 = vmul.f32 1.442695, %v2789_v3 }
 0xdaf   :  { %v2772_v18 = vpop.xlane.xlu0 %2771  ;;  %v3005_v11 = vpop.permute.xlu1 %3004 }
 0xdb0   :  { %v2788_v8 = vsub.f32 %v5259_v30, %v2772_v18  ;;  %4463 = vpow2.f32 %v2801_v59 }
 0xdb2   :  { %v4458_v27 = vpop.eup %4457  ;;  %v2799_v5 = vmul.f32 1.442695, %v2788_v8 }
 0xdb3   :  { %v2781_v56 = vpop.xlane.xlu0 %2780  ;;  %v2809_v58 = vsel %vm935_vm2, %v4458_v27, 0.0 }
 0xdb4   :  { %2810 = vadd.xlane.f32.xlu0 %v2809_v58  ;;  %v2791_v9 = vsub.f32 %v2759_v51, %v2781_v56  ;;  %4465 = vpow2.f32 %v2799_v5 }
 0xdb6   :  { %v5280_v60 = vpop.eup %4459  ;;  %v2805_v36 = vmul.f32 1.442695, %v2791_v9 }
 0xdb7   :  { %v5282_v52 = vpop.eup %4461  ;;  %v2851_v45 = vpop.permute.xlu0 %2850  ;;  %v2815_v2 = vsel %vm935_vm2, %v5280_v60, 0.0 }
 0xdb8   :  { %2816 = vadd.xlane.f32.xlu0 %v2815_v2  ;;  %4217 = vmatpush3.msra.mxu0 %v2851_v45  ;;  %v2812_v0 = vsel %vm935_vm2, %v5282_v52, 0.0  ;;  %4467 = vpow2.f32 %v2805_v36  ;;  %v3894_v36 = vld [vmem:[%s5442_s6 + $0x1] ss:$0 sm:$0xff] }
 0xdb9   :  { %2813 = vadd.xlane.f32.xlu1 %v2812_v0  ;;  %4226 = vmatprep.subr.mxu0 %v4601_v50  ;;  %v3889_v0 = vld [vmem:[%s5441_s5 + $0x20] sm:$0xff] }
 0xdba   :  { %v4464_v32 = vpop.eup %4463 }
 0xdbb   :  { %v2821_v30 = vsel %vm935_vm2, %v4464_v32, 0.0 }
 0xdbe   :  { %v4466_v48 = vpop.eup %4465 }
 0xdbf   :  { %v2818_v55 = vsel %vm935_vm2, %v4466_v48, 0.0 }
 0xdc2   :  { %v5298_v49 = vpop.eup %4467 }
 0xdc3   :  { %v2827_v62 = vsel %vm935_vm2, %v5298_v49, 0.0 }
 0xdca   :  { %3235 = vrot.lane.b32.xlu1 %v2126_v37, %s4594_s27  ;;  %v3890_v37 = vld [vmem:[%s5441_s5 + $0x28] sm:$0xff] }
 0xdcb   :  { %v4345_v3 = vpack.c.bf16 %v3890_v37, %v3889_v0 }
 0xdce   :  { %3158 = vrot.lane.b32.xlu0 %v2125_v35, %s4594_s27  ;;  %v3891_v35 = vld [vmem:[%s5441_s5 + $0x30] sm:$0xff] }
 0xde0   :  { %v2778_v13 = vpop.xlane.xlu1 %2777 }
 0xde1   :  { %v2790_v23 = vsub.f32 %v2758_v21, %v2778_v13 }
 0xde3   :  { %v2803_v38 = vmul.f32 1.442695, %v2790_v23 }
 0xde4   :  { %v2784_v25 = vpop.xlane.xlu1 %2783 }
 0xde5   :  { %4469 = vpow2.f32 %v2803_v38  ;;  %v2792_v20 = vsub.f32 %v2760_v14, %v2784_v25 }
 0xde7   :  { %v2807_v31 = vmul.f32 1.442695, %v2792_v20 }
 0xde8   :  { %v3082_v21 = vpop.permute.xlu1 %3081 }
 0xde9   :  { %4471 = vpow2.f32 %v2807_v31 }
 0xded   :  { %2822 = vadd.xlane.f32.xlu0 %v2821_v30 }
 0xdee   :  { %2819 = vadd.xlane.f32.xlu1 %v2818_v55 }
 0xdef   :  { %v5301_v51 = vpop.eup %4469 }
 0xdf0   :  { %v2824_v39 = vsel %vm935_vm2, %v5301_v51, 0.0 }
 0xdf1   :  { %2828 = vadd.xlane.f32.xlu0 %v2827_v62 }
 0xdf2   :  { %2825 = vadd.xlane.f32.xlu1 %v2824_v39 }
 0xdf3   :  { %v5307_v33 = vpop.eup %4471 }
 0xdf4   :  { %v2830_v53 = vsel %vm935_vm2, %v5307_v33, 0.0 }
 0xdf6   :  { %2831 = vadd.xlane.f32.xlu1 %v2830_v53 }
 0xe07   :  { %3389 = vrot.lane.b32.xlu1 %v2128_v6, %s4594_s27  ;;  %3312 = vrot.lane.b32.xlu0 %v2127_v61, %s4594_s27  ;;  %v3606_v6 = vld [vmem:[#allocation7 + $0x20] sm:$0xff]  ;;  %v3607_v61 = vld [vmem:[#allocation7 + $0x28] sm:$0xff] }
 0xe41   :  { %v2811_v4 = vpop.xlane.xlu0 %2810 }
 0xe42   :  { %4473 = vrcp.f32 %v2811_v4  ;;  %v4353_v4 = vpack.c.bf16 %v3607_v61, %v3606_v6 }
 0xe45   :  { %v2817_v14 = vpop.xlane.xlu0 %2816 }
 0xe46   :  { %v2814_v54 = vpop.xlane.xlu1 %2813 }
 0xe47   :  { %4475 = vrcp.f32 %v2814_v54 }
 0xe48   :  { %4477 = vrcp.f32 %v2817_v14  ;;  %v3609_v14 = vld [vmem:[#allocation7 + $0x38] sm:$0xff] }
 0xe49   :  { %v3159_v10 = vpop.permute.xlu0 %3158 }
 0xe4a   :  { %v3236_v15 = vpop.permute.xlu1 %3235 }
 0xe4c   :  { %v4474_v22 = vpop.eup %4473 }
 0xe4d   :  { %v2841_v7 = vmul.f32 %v4474_v22, %v4458_v27  ;;  %v3901_v22 = vld [vmem:[%s5445_s9 + $0x40] sm:$0xff] }
 0xe4f   :  { %4219 = vmatmul.mubr.msk.f32.vlgmr.msra.gmra.mrb[18].mxu0 %vm935_vm2, %v2841_v7  ;;  %v3902_v7 = vld [vmem:[%s5445_s9 + $0x48] sm:$0xff] }
 0xe50   :  { %4227 = vmatpush3.msra.mxu0 %v3005_v11  ;;  %4228 = vmatprep.mubr.msk.f32.mxu0 %vm4602_vm1, %v4601_v50 }
 0xe51   :  { %v4476_v24 = vpop.eup %4475  ;;  %4236 = vmatprep.subr.mxu0 %v4601_v50 }
 0xe52   :  { %v4478_v28 = vpop.eup %4477  ;;  %v2842_v16 = vmul.f32 %v4476_v24, %v5282_v52  ;;  %v3903_v24 = vld [vmem:[%s5445_s9 + $0x50] sm:$0xff] }
 0xe53   :  { %v2843_v17 = vmul.f32 %v4478_v28, %v5280_v60  ;;  %v4361_v28 = vpack.c.bf16 %v3902_v7, %v3901_v22 }
 0xe54   :  { %4224 = vmatmul.mubr.msk.f32.vlgmr.msra.gmra.mrb[28].mxu1 %vm935_vm2, %v2842_v16  ;;  %v3904_v16 = vld [vmem:[%s5445_s9 + $0x58] sm:$0xff] }
 0xe55   :  { %4232 = vmatpush3.msra.mxu1 %v3082_v21  ;;  %4233 = vmatprep.mubr.msk.f32.mxu1 %vm4602_vm1, %v4601_v50  ;;  %v3608_v21 = vld [vmem:[#allocation7 + $0x30] sm:$0xff] }
 0xe56   :  { %4241 = vmatprep.subr.mxu1 %v4601_v50  ;;  %v4357_v54 = vpack.c.bf16 %v3609_v14, %v3608_v21 }
 0xe57   :  { %4229 = vmatmul.mubr.msk.f32.vlgmr.msra.gmra.mrb[18].mxu0 %vm935_vm2, %v2843_v17  ;;  %v4365_v17 = vpack.c.bf16 %v3904_v16, %v3903_v24 }
 0xe58   :  { %4237 = vmatpush3.msra.mxu0 %v3159_v10  ;;  %4238 = vmatprep.mubr.msk.f32.mxu0 %vm4602_vm1, %v4601_v50  ;;  %v3905_v10 = vld [vmem:[%s5445_s9 + $0x60] sm:$0xff] }
 0xe59   :  { %4246 = vmatprep.subr.mxu0 %v4601_v50 }
 0xe7a   :  { %v2823_v41 = vpop.xlane.xlu0 %2822 }
 0xe7b   :  { %4479 = vrcp.f32 %v2823_v41  ;;  %v2820_v57 = vpop.xlane.xlu1 %2819 }
 0xe7c   :  { %4481 = vrcp.f32 %v2820_v57 }
 0xe7e   :  { %v2829_v12 = vpop.xlane.xlu0 %2828 }
 0xe7f   :  { %v2826_v40 = vpop.xlane.xlu1 %2825  ;;  %4483 = vrcp.f32 %v2829_v12 }
 0xe80   :  { %4485 = vrcp.f32 %v2826_v40 }
 0xe82   :  { %v3313_v18 = vpop.permute.xlu0 %3312 }
 0xe83   :  { %v2832_v29 = vpop.xlane.xlu1 %2831 }
 0xe84   :  { %4487 = vrcp.f32 %v2832_v29 }
 0xe85   :  { %v4480_v42 = vpop.eup %4479 }
 0xe86   :  { %v4482_v44 = vpop.eup %4481  ;;  %v2845_v46 = vmul.f32 %v4480_v42, %v4464_v32 }
 0xe87   :  { %v2844_v47 = vmul.f32 %v4482_v44, %v4466_v48  ;;  %v3390_v52 = vpop.permute.xlu1 %3389 }
 0xe88   :  { %4239 = vmatmul.mubr.msk.f32.vlgmr.msra.gmra.mrb[18].mxu0 %vm935_vm2, %v2845_v46 }
 0xe89   :  { %4234 = vmatmul.mubr.msk.f32.vlgmr.msra.gmra.mrb[28].mxu1 %vm935_vm2, %v2844_v47  ;;  %4247 = vmatpush3.msra.mxu0 %v3313_v18  ;;  %v4484_v27 = vpop.eup %4483  ;;  %v3596_v47 = vrot.slane %v5141_v1, %v1768_v63  ;;  %v3907_v63 = vld [vmem:[%s5445_s9 + $0x70] sm:$0xff] }
 0xe8a   :  { %4242 = vmatpush3.msra.mxu1 %v3236_v15  ;;  %4243 = vmatprep.mubr.msk.f32.mxu1 %vm4602_vm1, %v4601_v50  ;;  %v4486_v56 = vpop.eup %4485  ;;  %v2847_v58 = vmul.f32 %v4484_v27, %v5298_v49  ;;  %v3906_v15 = vld [vmem:[%s5445_s9 + $0x68] sm:$0xff]  ;;  %v3602_v27 = vrot.slane %v5141_v1, %v1774_v43  ;;  %v4373_v0 = vpack.c.bf16 %v3908_v34, %v3907_v63  ;;  %v3898_v43 = vld [vmem:[%s5444_s8 + $0x1] ss:$0 sm:$0xff]  ;;  %s4604_s9 = smov [#allocation8]  }
 0xe8b   :  { %4248 = vmatprep.mubr.msk.f32.mxu0 %vm4602_vm1, %v4601_v50  ;;  %4251 = vmatprep.subr.mxu1 %v4601_v50  ;;  %v2846_v60 = vmul.f32 %v4486_v56, %v5301_v51  ;;  %v4369_v41 = vpack.c.bf16 %v3906_v15, %v3905_v10  ;;  %s3808_s24 = sshll.u32 %s4604_s9, 4  ;;  %s3809_s24 = int_to_ptr.vmem [resolvable:$true] %s3808_s24 }
 0xe8c   :  { %4346 = vmatprep.subr.bf16.mxu0 %v4345_v3  ;;  %s4565_s8 = scalar_lea.vmem %s3809_s24, 256  ;;  %p4570_p11 = scmp.lt.s32.totalorder %s3809_s24, %s3809_s24 }
 0xe8d   :  { %p4566_p10 = scmp.ne.s32.totalorder %s3809_s24, %s4565_s8  ;;  %p4571_p12 = scmp.lt.s32.totalorder %s4565_s8, %s4565_s8 }
 0xe8e   :  { %v4488_v45 = vpop.eup %4487 }
 0xe8f   :  { %v2848_v2 = vmul.f32 %v4488_v45, %v5307_v33  ;;  %p4572_p13 = por %p4571_p12, %p4570_p11 }
 0xe90   :  { %4249 = vmatmul.mubr.msk.f32.vlgmr.msra.gmra.mrb[18].mxu0 %vm935_vm2, %v2847_v58 }
 0xe91   :  { %4244 = vmatmul.mubr.msk.f32.vlgmr.msra.gmra.mrb[28].mxu1 %vm935_vm2, %v2846_v60  ;;  %4348 = vmatpush3.bf16.msra.mxu0 %v4345_v3  ;;  %p4573_p0 = pnand %p4572_p13, %p4566_p10 }
 0xe92   :  { %4252 = vmatpush3.msra.mxu1 %v3390_v52  ;;  %4253 = vmatprep.mubr.msk.f32.mxu1 %vm4602_vm1, %v4601_v50  ;;  %v3892_v50 = vld [vmem:[%s5441_s5 + $0x38] sm:$0xff] }
 0xe93   :  { %v4349_v8 = vpack.c.bf16 %v3892_v50, %v3891_v35  ;;  %4354 = vmatprep.subr.bf16.mxu1 %v4353_v4 }
 0xe95   :  { %4350 = vmatprep.subr.bf16.mxu0 %v4349_v8 }
 0xe96   :  { %4352 = vmatpush3.bf16.msra.mxu0 %v4349_v8 }
 0xe97   :  { %4362 = vmatprep.subr.bf16.mxu0 %v4361_v28 }
 0xe99   :  { %4254 = vmatmul.mubr.msk.f32.vlgmr.msra.gmra.mrb[28].mxu1 %vm935_vm2, %v2848_v2 }
 0xe9a   :  { %4356 = vmatpush3.bf16.msra.mxu1 %v4353_v4 }
 0xe9b   :  { %4358 = vmatprep.subr.bf16.mxu1 %v4357_v54 }
 0xe9e   :  { %4360 = vmatpush3.bf16.msra.mxu1 %v4357_v54 }
 0xf63   :  { %v3384_v59 = vpop.f32.mrb[18].mxu0 }
 0xf64   :  { %v4250_v9 = vpop.f32.mrb[19].mxu0  ;;  %4264 = vmatprep.mubr.msk.f32.mxu0 %vm91_vm0, %v3384_v59  ;;  %v3910_v59 = vld [vmem:[%s5446_s10 + $0x1] ss:$0 sm:$0xff] }
 0xf6c   :  { %v3461_v11 = vpop.f32.mrb[28].mxu1 }
 0xf6d   :  { %v4255_v5 = vpop.f32.mrb[29].mxu1  ;;  %4265 = vmatmul.mubr.msk.f32.vlgmr.msra.gmra.mrb[20].mxu0 %vm91_vm0, %v3461_v11 }
 0xf6e   :  { %4364 = vmatpush3.bf16.msra.mxu0 %v4361_v28 }
 0xf6f   :  { %4366 = vmatprep.subr.bf16.mxu0 %v4365_v17 }
 0xf72   :  { %4368 = vmatpush3.bf16.msra.mxu0 %v4365_v17 }
 0xf73   :  { %4370 = vmatprep.subr.bf16.mxu0 %v4369_v41 }
 0xf76   :  { %4372 = vmatpush3.bf16.msra.mxu0 %v4369_v41 }
 0xf77   :  { %4374 = vmatprep.subr.bf16.mxu0 %v4373_v0 }
 0xf7a   :  { %4376 = vmatpush3.bf16.msra.mxu0 %v4373_v0 }
0x1040   :  { %v4266_v13 = vpop.f32.mrb[20].mxu0 }
0x1041   :  { %v3562_v23 = vadd.f32 %v4266_v13, %v3894_v36  ;;  %v3556_v38 = vpop.f32.mrb[21].mxu0 }
0x1042   :  { %v3557_v25 = vadd.f32 %v3894_v36, %v3556_v38 }
0x1043   :  { %v5364_v20 = vadd.f32 %v3562_v23, %v5115_v19 }
0x1044   :  { %v5367_v31 = vadd.f32 %v3557_v25, %v5118_v26 }
0x1045   :  { %v3570_v32 = vsel %vm91_vm0, %v5364_v20, 0.0 }
0x1046   :  { %3571 = vadd.xlane.f32.xlu1 %v3570_v32  ;;  %v3567_v48 = vsel %vm91_vm0, %v5367_v31, 0.0 }
0x1047   :  { %3568 = vadd.xlane.f32.xlu0 %v3567_v48 }
0x10d3   :  { %v3572_v30 = vpop.xlane.xlu1 %3571 }
0x10d4   :  { %v3574_v49 = vmul.f32 0.03125, %v3572_v30  ;;  %v3569_v55 = vpop.xlane.xlu0 %3568 }
0x10d5   :  { %v3573_v51 = vmul.f32 0.03125, %v3569_v55 }
0x10d6   :  { %v3576_v62 = vsub.f32 %v5364_v20, %v3574_v49 }
0x10d7   :  { %v3575_v19 = vsub.f32 %v5367_v31, %v3573_v51 }
0x10d8   :  { %v3578_v33 = vmul.f32 %v3576_v62, %v3576_v62 }
0x10d9   :  { %v3577_v39 = vmul.f32 %v3575_v19, %v3575_v19 }
0x10da   :  { %v3582_v53 = vsel %vm91_vm0, %v3578_v33, 0.0 }
0x10db   :  { %v3579_v26 = vsel %vm91_vm0, %v3577_v39, 0.0 }
0x10dc   :  { %3580 = vadd.xlane.f32.xlu0 %v3579_v26 }
0x10e0   :  { %3583 = vadd.xlane.f32.xlu0 %v3582_v53 }
0x1169   :  { %v3581_v57 = vpop.xlane.xlu0 %3580 }
0x116a   :  { %v3585_v12 = vmul.f32 0.03125, %v3581_v57 }
0x116c   :  { %v3587_v40 = vadd.f32 1e-05, %v3585_v12 }
0x116d   :  { %v3584_v42 = vpop.xlane.xlu0 %3583 }
0x116e   :  { %4489 = vrsqrt.f32 %v3587_v40  ;;  %v3586_v44 = vmul.f32 0.03125, %v3584_v42 }
0x1170   :  { %v3588_v46 = vadd.f32 1e-05, %v3586_v44 }
0x1172   :  { %4491 = vrsqrt.f32 %v3588_v46 }
0x1178   :  { %v4490_v29 = vpop.eup %4489 }
0x1179   :  { %v3591_v18 = vmul.f32 %v4490_v29, %v3575_v19 }
0x117b   :  { %v3597_v56 = vmul.f32 %v3596_v47, %v3591_v18 }
0x117c   :  { %v4492_v58 = vpop.eup %4491 }
0x117d   :  { %v3592_v60 = vmul.f32 %v4492_v58, %v3576_v62  ;;  %v3603_v52 = vadd.f32 %v3602_v27, %v3597_v56 }
0x117f   :  { %v3598_v45 = vmul.f32 %v3596_v47, %v3592_v60  ;;  %4275 = vmatprep.mubr.msk.f32.mxu1 %vm91_vm0, %v3603_v52 }
0x1181   :  { %v3604_v2 = vadd.f32 %v3602_v27, %v3598_v45 }
0x1183   :  { %4276 = vmatmul.mubr.msk.f32.vlgmr.msra.gmra.mrb[30].mxu1 %vm91_vm0, %v3604_v2 }
0x1256   :  { %v4277_v1 = vpop.f32.mrb[30].mxu1 }
0x1257   :  { %v3696_v37 = vadd.f32 %v4277_v1, %v3898_v43  ;;  %v3690_v35 = vpop.f32.mrb[31].mxu1 }
0x1258   :  { %v3691_v3 = vadd.f32 %v3898_v43, %v3690_v35 }
0x1259   :  { %v3700_v8 = vmax.f32 %v3696_v37, 0.0 }
0x125a   :  { %v3699_v50 = vmax.f32 %v3691_v3, 0.0 }
0x125c   :  { %4294 = vmatprep.mubr.msk.f32.mxu0 %vm1887_vm3, %v3699_v50 }
0x125d   :  { %4295 = vmatmul.mubr.msk.f32.vlgmr.msra.gmra.mrb[22].mxu0 %vm1887_vm3, %v3700_v8 }
0x1330   :  { %v4296_v9 = vpop.f32.mrb[22].mxu0 }
0x1331   :  { %v3796_v11 = vadd.f32 %v4296_v9, %v3910_v59  ;;  %v3790_v5 = vpop.f32.mrb[23].mxu0 }
0x1332   :  { %v3791_v36 = vadd.f32 %v3910_v59, %v3790_v5 }
0x1333   :  { %v3800_v13 = vadd.f32 %v3796_v11, %v5364_v20 }
0x1334   :  { %v3799_v23 = vadd.f32 %v3791_v36, %v5367_v31 }
0x1335   :  { %3802 = vst.msk [vmem:[#allocation8 + $0x8] sm:$0xff] %vm91_vm0, %v3800_v13 }
0x1336   :  { %3801 = vst.msk [vmem:[#allocation8] sm:$0xff] %vm91_vm0, %v3799_v23 }
0x1337   :  { %4576 = shalt.err (!%p4573_p0)
}
0x1338   :  { %s4577_s28 = scalar_lea.hbm %s5447_s11, 256 }
0x1339   :  { %p4578_p1 = scmp.ne.s32.totalorder %s5447_s11, %s4577_s28  ;;  %p4581_p2 = scmp.lt.u32.totalorder %s4577_s28, %s5447_s11 }
0x133b   :  { %p4583_p3 = pnand %p4581_p2, %p4578_p1 }
0x133d   :  { %4586 = shalt.err (!%p4583_p3)
}
0x133e   :  { %3814 = dma.vmem_to_hbm [thread:$0]  %s3809_s24, 256, %s5447_s11, [#allocation4], %s4597_s2, %s4597_s2, %s4598_s18  }
0x133f   :  { %4591 = dma.done.wait [#allocation4], 256  }
0x1340   :  { %4592 = vsyncadd [#allocation4], 4294967040 }
0x1341   :  { %3818 = vsyncpa [#allocation3], 1 }
0x1342   :  { %3819 = vsyncpa [#allocation6], 1 }
0x1343   :  { %3820 = vsyncpa [#allocation4], 1 }

</bundles_post_ra>
